<compile_context>
chip_gen: v7x
topology: tpu7x:2x2x1
jax: 0.10.0
libtpu: 0.0.40
codegen_flags: <defaults>
</compile_context>

<pallas_src>
import functools

import jax
import jax.numpy as jnp
from jax.experimental import pallas as pl
from jax.experimental.pallas import tpu as pltpu

_LANE = 128
_PATCH_VMEM_BUDGET = 8 * 1024 * 1024   # bytes allowed for the im2col patch scratch


def _round_up(x, m):
    return (x + m - 1) // m * m


def _pick_row_chunk(H, W, Cp, budget_bytes):
    """Largest divisor TH of H whose (TH*W, 9*Cp) f32 patch fits the budget.

    Prefers TH with TH*W a multiple of 8 so chunk stores stay sublane-aligned.
    """
    best, best_aligned = 1, None
    for th in range(1, H + 1):
        if H % th:
            continue
        if th * W * 9 * Cp * 4 > budget_bytes:
            continue
        best = th
        if (th * W) % 8 == 0:
            best_aligned = th
    return best_aligned if best_aligned is not None else best


def _conv3x3_kernel(x_ref, w_ref, b_ref, o_ref, patch_ref, *, H, W, TH, Cp):
    # x_ref:     (1, H+2, W+2, Cp)   zero-padded input tile for one batch element
    # w_ref:     (9*Cp, CoT)         im2col weight bank tile, row = (ky*3+kx)*Cp + cin
    # b_ref:     (1, CoT)            bias tile (zeros in the padded channel tail)
    # o_ref:     (1, H*W, CoT)       lane-dense output slab for this Cout tile
    # patch_ref: (TH*W, 9*Cp)        VMEM scratch holding one row-chunk of im2col rows
    n_chunks = H // TH
    rows = TH * W

    def build_patch(h0):
        for k in range(9):                                   # static, unrolled 3x3 taps
            ky, kx = divmod(k, 3)
            tap = x_ref[0, h0 + ky:h0 + ky + TH, kx:kx + W, :]   # (TH, W, Cp), static slice
            patch_ref[:, k * Cp:(k + 1) * Cp] = tap.reshape(rows, Cp)

    for c in range(n_chunks):
        h0 = c * TH
        if n_chunks == 1:
            # Patch covers the whole image: identical for every Cout tile of this
            # batch element, so build it only on the first Cout step and reuse
            # the persistent scratch for the rest (Cout axis is "arbitrary", so
            # all its steps for a given image run in order on the same core).
            @pl.when(pl.program_id(1) == 0)
            def _():
                build_patch(0)
        else:
            build_patch(h0)

        # One MXU matmul over the whole contraction (K = 9*Cp), f32 accumulation.
        acc = jnp.dot(patch_ref[...], w_ref[...], preferred_element_type=jnp.float32)
        acc = acc + b_ref[...]                              # (1, CoT) broadcasts over rows
        o_ref[0, c * rows:(c + 1) * rows, :] = acc.astype(o_ref.dtype)


def key_projection_pallas(x_nchw, weight_oihw, bias):
    """Equivalent of KeyProjection.forward: Conv2d(indim, keydim, 3, padding=1).

    x_nchw:      (N, Cin, H, W)    float32
    weight_oihw: (Cout, Cin, 3, 3) float32 (PyTorch conv layout)
    bias:        (Cout,)           float32
    returns:     (N, Cout, H, W)   float32
    """
    N, Cin, H, W = x_nchw.shape
    Cout = weight_oihw.shape[0]
    Cp = _round_up(Cin, _LANE)       # lane-dense input channels / MXU K depth
    CoT = _LANE                      # output-channel tile width (lane-dense)
    Cop = _round_up(Cout, CoT)
    n_co = Cop // CoT
    TH = _pick_row_chunk(H, W, Cp, _PATCH_VMEM_BUDGET)

    # Layout glue (XLA side): NCHW -> NHWC, spatial zero pad (padding=1),
    # channel pad to a multiple of 128.
    x_nhwc = jnp.transpose(x_nchw, (0, 2, 3, 1))                       # (N, H, W, Cin)
    x_pad = jnp.pad(x_nhwc, ((0, 0), (1, 1), (1, 1), (0, Cp - Cin)))   # (N, H+2, W+2, Cp)

    # OIHW -> (ky, kx, cin, cout); zero-pad channels; flatten to the im2col bank.
    w_t = jnp.transpose(weight_oihw, (2, 3, 1, 0))                     # (3, 3, Cin, Cout)
    w_t = jnp.pad(w_t, ((0, 0), (0, 0), (0, Cp - Cin), (0, Cop - Cout)))
    w_bank = w_t.reshape(9 * Cp, Cop)                                  # (9*Cp, Cop)
    b2 = jnp.pad(bias, (0, Cop - Cout)).reshape(1, Cop)

    kernel = functools.partial(_conv3x3_kernel, H=H, W=W, TH=TH, Cp=Cp)

    out_flat = pl.pallas_call(
        kernel,
        out_shape=jax.ShapeDtypeStruct((N, H * W, Cop), x_nchw.dtype),
        grid_spec=pltpu.PrefetchScalarGridSpec(
            num_scalar_prefetch=0,
            grid=(N, n_co),
            in_specs=[
                pl.BlockSpec((1, H + 2, W + 2, Cp), lambda n, co: (n, 0, 0, 0)),
                pl.BlockSpec((9 * Cp, CoT), lambda n, co: (0, co)),
                pl.BlockSpec((1, CoT), lambda n, co: (0, co)),
            ],
            out_specs=pl.BlockSpec((1, H * W, CoT), lambda n, co: (n, 0, co)),
            scratch_shapes=[pltpu.VMEM((TH * W, 9 * Cp), jnp.float32)],
        ),
        compiler_params=pltpu.CompilerParams(
            dimension_semantics=("parallel", "arbitrary"),
            vmem_limit_bytes=32 * 1024 * 1024,
        ),
    )(x_pad, w_bank, b2)

    # Drop the padded output channels and return NCHW like the PyTorch module.
    out = out_flat[:, :, :Cout].reshape(N, H, W, Cout)
    return jnp.transpose(out, (0, 3, 1, 2))


def make_params(key, indim, keydim):
    """Deterministic parameter init mirroring the module's __init__:
    orthogonal conv weight (flattened over Cin*3*3), zero bias."""
    flat = jax.random.normal(key, (keydim, indim * 3 * 3), dtype=jnp.float32)
    q, r = jnp.linalg.qr(flat.T)                 # (indim*9, keydim)
    q = q * jnp.sign(jnp.diagonal(r))[None, :]   # sign fix for determinism
    weight = q.T.reshape(keydim, indim, 3, 3).astype(jnp.float32)
    bias = jnp.zeros((keydim,), dtype=jnp.float32)
    return weight, bias


if __name__ == "__main__":
    # Small shapes consistent with the module: N=2, indim=4, keydim=8, 16x16.
    N, indim, keydim, H, W = 2, 4, 8, 16, 16

    key = jax.random.PRNGKey(0)
    kx_, kw_ = jax.random.split(key)
    x = jax.random.normal(kx_, (N, indim, H, W), dtype=jnp.float32)
    weight, bias = make_params(kw_, indim, keydim)

    out = jax.block_until_ready(key_projection_pallas(x, weight, bias))

    # Reference check with XLA's conv (NCHW, OIHW, padding=1).
    ref = jax.lax.conv_general_dilated(
        x, weight, window_strides=(1, 1), padding=((1, 1), (1, 1)),
        dimension_numbers=("NCHW", "OIHW", "NCHW")) + bias[None, :, None, None]
    assert out.shape == (N, keydim, H, W)
    assert jnp.allclose(out, ref, atol=1e-4, rtol=1e-4)

    print("KERNEL_OK")
</pallas_src>

<mosaic_0001>
module attributes {stable_mosaic.version = 11 : i64} {
  func.func @_conv3x3_kernel(%arg0: i32, %arg1: i32, %arg2: memref<1x18x18x128xf32, #tpu.memory_space<vmem>>, %arg3: memref<1152x128xf32, #tpu.memory_space<vmem>>, %arg4: memref<1x128xf32, #tpu.memory_space<vmem>>, %arg5: memref<1x256x128xf32, #tpu.memory_space<vmem>>, %arg6: memref<256x1152xf32, #tpu.memory_space<vmem>>) attributes {dimension_semantics = [#tpu.dimension_semantics<parallel>, #tpu.dimension_semantics<arbitrary>], iteration_bounds = array<i64: 2, 1>, scalar_prefetch = 0 : i64, scratch_operands = 1 : i64, tpu.core_type = #tpu.core_type<tc>, window_params = [{transform_indices = @transform_0, window_bounds = array<i64: 1, 18, 18, 128>}, {transform_indices = @transform_1, window_bounds = array<i64: 1152, 128>}, {transform_indices = @transform_2, window_bounds = array<i64: 1, 128>}, {transform_indices = @transform_3, window_bounds = array<i64: 1, 256, 128>}]} {
    %c0_i32 = arith.constant 0 : i32
    %0 = arith.cmpi eq, %arg1, %c0_i32 : i32
    %1 = arith.extui %0 : i1 to i32
    %c0_i32_0 = arith.constant 0 : i32
    %2 = arith.cmpi ne, %1, %c0_i32_0 : i32
    scf.if %2 {
      %c0_9 = arith.constant 0 : index
      %c0_10 = arith.constant 0 : index
      %c0_11 = arith.constant 0 : index
      %c0_12 = arith.constant 0 : index
      %12 = vector.load %arg2[%c0_9, %c0_10, %c0_11, %c0_12] : memref<1x18x18x128xf32, #tpu.memory_space<vmem>>, vector<1x16x16x128xf32>
      %13 = vector.shape_cast %12 : vector<1x16x16x128xf32> to vector<16x16x128xf32>
      %14 = vector.shape_cast %13 : vector<16x16x128xf32> to vector<256x128xf32>
      %c0_13 = arith.constant 0 : index
      %c0_14 = arith.constant 0 : index
      %15 = vector.load %arg6[%c0_13, %c0_14] : memref<256x1152xf32, #tpu.memory_space<vmem>>, vector<256x128xf32>
      tpu.vector_store %arg6[%c0_13, %c0_14], %14 {strides = array<i32>} : memref<256x1152xf32, #tpu.memory_space<vmem>>, vector<256x128xf32>,
      %c0_15 = arith.constant 0 : index
      %c0_16 = arith.constant 0 : index
      %c1 = arith.constant 1 : index
      %c0_17 = arith.constant 0 : index
      %16 = vector.load %arg2[%c0_15, %c0_16, %c1, %c0_17] : memref<1x18x18x128xf32, #tpu.memory_space<vmem>>, vector<1x16x16x128xf32>
      %17 = vector.shape_cast %16 : vector<1x16x16x128xf32> to vector<16x16x128xf32>
      %18 = vector.shape_cast %17 : vector<16x16x128xf32> to vector<256x128xf32>
      %c0_18 = arith.constant 0 : index
      %c128 = arith.constant 128 : index
      %19 = vector.load %arg6[%c0_18, %c128] : memref<256x1152xf32, #tpu.memory_space<vmem>>, vector<256x128xf32>
      tpu.vector_store %arg6[%c0_18, %c128], %18 {strides = array<i32>} : memref<256x1152xf32, #tpu.memory_space<vmem>>, vector<256x128xf32>,
      %c0_19 = arith.constant 0 : index
      %c0_20 = arith.constant 0 : index
      %c2 = arith.constant 2 : index
      %c0_21 = arith.constant 0 : index
      %20 = vector.load %arg2[%c0_19, %c0_20, %c2, %c0_21] : memref<1x18x18x128xf32, #tpu.memory_space<vmem>>, vector<1x16x16x128xf32>
      %21 = vector.shape_cast %20 : vector<1x16x16x128xf32> to vector<16x16x128xf32>
      %22 = vector.shape_cast %21 : vector<16x16x128xf32> to vector<256x128xf32>
      %c0_22 = arith.constant 0 : index
      %c256 = arith.constant 256 : index
      %23 = vector.load %arg6[%c0_22, %c256] : memref<256x1152xf32, #tpu.memory_space<vmem>>, vector<256x128xf32>
      tpu.vector_store %arg6[%c0_22, %c256], %22 {strides = array<i32>} : memref<256x1152xf32, #tpu.memory_space<vmem>>, vector<256x128xf32>,
      %c0_23 = arith.constant 0 : index
      %c1_24 = arith.constant 1 : index
      %c0_25 = arith.constant 0 : index
      %c0_26 = arith.constant 0 : index
      %24 = vector.load %arg2[%c0_23, %c1_24, %c0_25, %c0_26] : memref<1x18x18x128xf32, #tpu.memory_space<vmem>>, vector<1x16x16x128xf32>
      %25 = vector.shape_cast %24 : vector<1x16x16x128xf32> to vector<16x16x128xf32>
      %26 = vector.shape_cast %25 : vector<16x16x128xf32> to vector<256x128xf32>
      %c0_27 = arith.constant 0 : index
      %c384 = arith.constant 384 : index
      %27 = vector.load %arg6[%c0_27, %c384] : memref<256x1152xf32, #tpu.memory_space<vmem>>, vector<256x128xf32>
      tpu.vector_store %arg6[%c0_27, %c384], %26 {strides = array<i32>} : memref<256x1152xf32, #tpu.memory_space<vmem>>, vector<256x128xf32>,
      %c0_28 = arith.constant 0 : index
      %c1_29 = arith.constant 1 : index
      %c1_30 = arith.constant 1 : index
      %c0_31 = arith.constant 0 : index
      %28 = vector.load %arg2[%c0_28, %c1_29, %c1_30, %c0_31] : memref<1x18x18x128xf32, #tpu.memory_space<vmem>>, vector<1x16x16x128xf32>
      %29 = vector.shape_cast %28 : vector<1x16x16x128xf32> to vector<16x16x128xf32>
      %30 = vector.shape_cast %29 : vector<16x16x128xf32> to vector<256x128xf32>
      %c0_32 = arith.constant 0 : index
      %c512 = arith.constant 512 : index
      %31 = vector.load %arg6[%c0_32, %c512] : memref<256x1152xf32, #tpu.memory_space<vmem>>, vector<256x128xf32>
      tpu.vector_store %arg6[%c0_32, %c512], %30 {strides = array<i32>} : memref<256x1152xf32, #tpu.memory_space<vmem>>, vector<256x128xf32>,
      %c0_33 = arith.constant 0 : index
      %c1_34 = arith.constant 1 : index
      %c2_35 = arith.constant 2 : index
      %c0_36 = arith.constant 0 : index
      %32 = vector.load %arg2[%c0_33, %c1_34, %c2_35, %c0_36] : memref<1x18x18x128xf32, #tpu.memory_space<vmem>>, vector<1x16x16x128xf32>
      %33 = vector.shape_cast %32 : vector<1x16x16x128xf32> to vector<16x16x128xf32>
      %34 = vector.shape_cast %33 : vector<16x16x128xf32> to vector<256x128xf32>
      %c0_37 = arith.constant 0 : index
      %c640 = arith.constant 640 : index
      %35 = vector.load %arg6[%c0_37, %c640] : memref<256x1152xf32, #tpu.memory_space<vmem>>, vector<256x128xf32>
      tpu.vector_store %arg6[%c0_37, %c640], %34 {strides = array<i32>} : memref<256x1152xf32, #tpu.memory_space<vmem>>, vector<256x128xf32>,
      %c0_38 = arith.constant 0 : index
      %c2_39 = arith.constant 2 : index
      %c0_40 = arith.constant 0 : index
      %c0_41 = arith.constant 0 : index
      %36 = vector.load %arg2[%c0_38, %c2_39, %c0_40, %c0_41] : memref<1x18x18x128xf32, #tpu.memory_space<vmem>>, vector<1x16x16x128xf32>
      %37 = vector.shape_cast %36 : vector<1x16x16x128xf32> to vector<16x16x128xf32>
      %38 = vector.shape_cast %37 : vector<16x16x128xf32> to vector<256x128xf32>
      %c0_42 = arith.constant 0 : index
      %c768 = arith.constant 768 : index
      %39 = vector.load %arg6[%c0_42, %c768] : memref<256x1152xf32, #tpu.memory_space<vmem>>, vector<256x128xf32>
      tpu.vector_store %arg6[%c0_42, %c768], %38 {strides = array<i32>} : memref<256x1152xf32, #tpu.memory_space<vmem>>, vector<256x128xf32>,
      %c0_43 = arith.constant 0 : index
      %c2_44 = arith.constant 2 : index
      %c1_45 = arith.constant 1 : index
      %c0_46 = arith.constant 0 : index
      %40 = vector.load %arg2[%c0_43, %c2_44, %c1_45, %c0_46] : memref<1x18x18x128xf32, #tpu.memory_space<vmem>>, vector<1x16x16x128xf32>
      %41 = vector.shape_cast %40 : vector<1x16x16x128xf32> to vector<16x16x128xf32>
      %42 = vector.shape_cast %41 : vector<16x16x128xf32> to vector<256x128xf32>
      %c0_47 = arith.constant 0 : index
      %c896 = arith.constant 896 : index
      %43 = vector.load %arg6[%c0_47, %c896] : memref<256x1152xf32, #tpu.memory_space<vmem>>, vector<256x128xf32>
      tpu.vector_store %arg6[%c0_47, %c896], %42 {strides = array<i32>} : memref<256x1152xf32, #tpu.memory_space<vmem>>, vector<256x128xf32>,
      %c0_48 = arith.constant 0 : index
      %c2_49 = arith.constant 2 : index
      %c2_50 = arith.constant 2 : index
      %c0_51 = arith.constant 0 : index
      %44 = vector.load %arg2[%c0_48, %c2_49, %c2_50, %c0_51] : memref<1x18x18x128xf32, #tpu.memory_space<vmem>>, vector<1x16x16x128xf32>
      %45 = vector.shape_cast %44 : vector<1x16x16x128xf32> to vector<16x16x128xf32>
      %46 = vector.shape_cast %45 : vector<16x16x128xf32> to vector<256x128xf32>
      %c0_52 = arith.constant 0 : index
      %c1024 = arith.constant 1024 : index
      %47 = vector.load %arg6[%c0_52, %c1024] : memref<256x1152xf32, #tpu.memory_space<vmem>>, vector<256x128xf32>
      tpu.vector_store %arg6[%c0_52, %c1024], %46 {strides = array<i32>} : memref<256x1152xf32, #tpu.memory_space<vmem>>, vector<256x128xf32>,
    } else {
    }
    %c0 = arith.constant 0 : index
    %c0_1 = arith.constant 0 : index
    %3 = vector.load %arg6[%c0, %c0_1] : memref<256x1152xf32, #tpu.memory_space<vmem>>, vector<256x1152xf32>
    %c0_2 = arith.constant 0 : index
    %c0_3 = arith.constant 0 : index
    %4 = vector.load %arg3[%c0_2, %c0_3] : memref<1152x128xf32, #tpu.memory_space<vmem>>, vector<1152x128xf32>
    %cst = arith.constant dense<0.000000e+00> : vector<256x128xf32>
    %5 = tpu.matmul %3, %4, %cst {dimension_numbers = #tpu.dot_dimension_numbers<[1], [0], [0], [1], [0, 0, 1, 1], [], []>} : vector<256x1152xf32>, vector<1152x128xf32>, vector<256x128xf32> -> vector<256x128xf32>
    %c0_4 = arith.constant 0 : index
    %c0_5 = arith.constant 0 : index
    %6 = vector.load %arg4[%c0_4, %c0_5] : memref<1x128xf32, #tpu.memory_space<vmem>>, vector<1x128xf32>
    %7 = vector.broadcast %6 : vector<1x128xf32> to vector<256x128xf32>
    %8 = arith.addf %5, %7 : vector<256x128xf32>
    %c0_6 = arith.constant 0 : index
    %c0_7 = arith.constant 0 : index
    %c0_8 = arith.constant 0 : index
    %9 = vector.load %arg5[%c0_6, %c0_7, %c0_8] : memref<1x256x128xf32, #tpu.memory_space<vmem>>, vector<1x256x128xf32>
    %10 = vector.shape_cast %9 : vector<1x256x128xf32> to vector<256x128xf32>
    %11 = vector.shape_cast %8 : vector<256x128xf32> to vector<1x256x128xf32>
    tpu.vector_store %arg5[%c0_6, %c0_7, %c0_8], %11 {strides = array<i32>} : memref<1x256x128xf32, #tpu.memory_space<vmem>>, vector<1x256x128xf32>,
    return
  }
  func.func @transform_0(%arg0: i32, %arg1: i32) -> (i32, i32, i32, i32) {
    %c0_i32 = arith.constant 0 : i32
    %c0_i32_0 = arith.constant 0 : i32
    %c0_i32_1 = arith.constant 0 : i32
    %c0_i32_2 = arith.constant 0 : i32
    return %arg0, %c0_i32, %c0_i32_0, %c0_i32_1 : i32, i32, i32, i32
  }
  func.func @transform_1(%arg0: i32, %arg1: i32) -> (i32, i32) {
    %c0_i32 = arith.constant 0 : i32
    %c0_i32_0 = arith.constant 0 : i32
    return %c0_i32, %arg1 : i32, i32
  }
  func.func @transform_2(%arg0: i32, %arg1: i32) -> (i32, i32) {
    %c0_i32 = arith.constant 0 : i32
    %c0_i32_0 = arith.constant 0 : i32
    return %c0_i32, %arg1 : i32, i32
  }
  func.func @transform_3(%arg0: i32, %arg1: i32) -> (i32, i32, i32) {
    %c0_i32 = arith.constant 0 : i32
    %c0_i32_0 = arith.constant 0 : i32
    return %arg0, %c0_i32, %arg1 : i32, i32, i32
  }
}

</mosaic_0001>

<bundles_post_ra>
// kernel: tpu_custom_call.1
= control target key start
LH: loop header
LB: loop body
LE: loop exit
PB: predicated region body
PF: predicated region fallthrough
CT: control target
= control target key end

     0   :  { %8 = vsyncpa [#allocation4], 0  ;;  %s4982_s0 = inlined_call_operand.vmem [shape: f32[2,18,18,128], index: 0, kind: input, shape index: {}]   ;;  %s4983_s1 = inlined_call_operand.vmem [shape: f32[1152,128], index: 1, kind: input, shape index: {}]   ;;  %s4984_s2 = inlined_call_operand.vmem [shape: f32[1,128], index: 2, kind: input, shape index: {}]   ;;  %s4985_s3 = inlined_call_operand.hbm [shape: f32[2,256,128], index: 3, kind: output, shape index: {}]  }
   0x1   :  { %10 = vsyncpa [#allocation4 + $0x1], 0  ;;  %s3429_s12 = smov 0   ;;  %s3431_s13 = smov 0  }
   0x2   :  { %s3433_s14 = smov 0   ;;  %s3435_s15 = smov 0  }
   0x3   :  { %s3437_s16 = smov 0   ;;  %s3439_s17 = smov 0  }
   0x4 LB: > { %s2506_s18 = sadd.s32 4294967295, %s3403_s17   ;;  %s2507_s19 = sadd.s32 4294967294, %s3403_s17   ;;  %s3403_s17 = sphi %s3439_s17, %s16_s17   ;;  %s3399_s16 = sphi %s3437_s16, %s5132_s16   ;;  %s3395_s15 = sphi %s3435_s15, %s5131_s15   ;;  %s3391_s14 = sphi %s3433_s14, %s5130_s14   ;;  %s3387_s13 = sphi %s3431_s13, %s5129_s13   ;;  %s3383_s12 = sphi %s3429_s12, %s5128_s12  }
   0x5   : > { %s28_s20 = sadd.s32 1, %s3399_s16  ;;  %s115_s21 = sadd.s32 1, %s3391_s14 }
   0x6   : > { %p30_p0 = scmp.ge.s32.totalorder %s28_s20, 2  ;;  %p125_p1 = scmp.ne.s32.totalorder %s3391_s14, %s3387_s13 }
   0x7   : > { %p126_p2 = scmp.eq.s32.totalorder %s2506_s18, 1  ;;  %p131_p3 = scmp.ne.s32.totalorder %s3387_s13, %s3383_s12 }
   0x8   : > { %s5134_s20 = smov (%p30_p0, %s28_s20), 0  ;;  %p132_p5 = scmp.eq.s32.totalorder %s2507_s19, 1 }
   0x9   : > { %p3469_p4 = por %p126_p2, %p125_p1  ;;  %s110_s23 = ssub.s32 %s3399_s16, %s5134_s20 }
   0xa   : > { %p2512_p6 = scmp.ge.s32.totalorder %s3403_s17, 1  ;;  %p113_p7 = scmp.eq.s32.totalorder %s110_s23, 0 }
   0xb   : > { %p3476_p8 = por %p132_p5, %p131_p3  ;;  %p171_p9 = scmp.lt.s32.totalorder %s3403_s17, 3 }
   0xc   : > { %s3482_s25 = scalar_select %p113_p7, %s3391_s14, %s115_s21  }
   0xd   : > { %p172_p10 = pnand %p2512_p6, %p171_p9 }
   0xf   : > { %175 = sbr.rel (%p172_p10) target bundleno = 604 (0x25c), region = 32 }
  0x16   : > { %v1084_v0 = vld [vmem:[%s4983_s1] sm:$0xff]  ;;  %v1085_v1 = vld [vmem:[%s4983_s1 + $0x8] sm:$0xff]  ;;  %v4986_v3 = vmov 0.0|0.0   ;;  %v1086_v6 = vld [vmem:[%s4983_s1 + $0x10] sm:$0xff]  ;;  %p202_p11 = scmp.lt.s32.totalorder %s3395_s15, 1  ;;  %s199_s29 = sand.u32 1, %s3387_s13  }
  0x17   : > { %v1116_v2 = vld [vmem:[%s4983_s1 + $0x100] sm:$0xff]  ;;  %2842 = vmatprep.subr.bf16.mxu1 %v4986_v3  ;;  %2890 = vmatprep.subr.bf16.mxu0 %v4986_v3  ;;  %v2843_v4 = vpack.c.bf16 %v1085_v1, %v1084_v0  ;;  %v1117_v5 = vld [vmem:[%s4983_s1 + $0x108] sm:$0xff]  ;;  %v1087_v7 = vld [vmem:[%s4983_s1 + $0x18] sm:$0xff]  ;;  %s2513_s30 = sshll.u32 %s199_s29, 8  ;;  %s2713_s5 = sshll.u32 %s3395_s15, 12 }
  0x18   : > { %v2891_v8 = vpack.c.bf16 %v1117_v5, %v1116_v2  ;;  %v1118_v9 = vld [vmem:[%s4983_s1 + $0x110] sm:$0xff]  ;;  %v1119_v10 = vld [vmem:[%s4983_s1 + $0x118] sm:$0xff]  ;;  %v2846_v11 = vpack.c.bf16 %v1087_v7, %v1086_v6  ;;  %v1088_v13 = vld [vmem:[%s4983_s1 + $0x20] sm:$0xff]  ;;  %s203_s21 = scalar_select %p202_p11, %s3395_s15, 1 }
  0x19   : > { %2844 = vmatpush1.bf16.msra.mxu1 %v2843_v4  ;;  %v2894_v12 = vpack.c.bf16 %v1119_v10, %v1118_v9  ;;  %v1089_v14 = vld [vmem:[%s4983_s1 + $0x28] sm:$0xff]  ;;  %v1120_v15 = vld [vmem:[%s4983_s1 + $0x120] sm:$0xff]  ;;  %v1090_v19 = vld [vmem:[%s4983_s1 + $0x30] sm:$0xff]  ;;  %s4827_s4 = scalar_lea.vmem [#allocation3], %s2513_s30  ;;  %s4927_s9 = scalar_lea.hbm %s4985_s3, %s2713_s5 }
  0x1a   : > { %2892 = vmatpush1.bf16.msra.mxu0 %v2891_v8  ;;  %2845 = vmatprep.subr.bf16.mxu1 %v4986_v3  ;;  %v1121_v16 = vld [vmem:[%s4983_s1 + $0x128] sm:$0xff]  ;;  %v2849_v17 = vpack.c.bf16 %v1089_v14, %v1088_v13  ;;  %v1091_v20 = vld [vmem:[%s4983_s1 + $0x38] sm:$0xff]  ;;  %v1122_v21 = vld [vmem:[%s4983_s1 + $0x130] sm:$0xff]  ;;  %s3266_s6 = smul.u32 432, %s203_s21  ;;  %s2407_s7 = sshll.u32 %s4827_s4, 4  ;;  %s4929_s7 = int_to_ptr.vmem [resolvable:$true] %s2407_s7 }
  0x1b   : > { %2893 = vmatprep.subr.bf16.mxu0 %v4986_v3  ;;  %v2897_v18 = vpack.c.bf16 %v1121_v16, %v1120_v15  ;;  %v1123_v22 = vld [vmem:[%s4983_s1 + $0x138] sm:$0xff]  ;;  %v2852_v23 = vpack.c.bf16 %v1091_v20, %v1090_v19  ;;  %v1092_v25 = vld [vmem:[%s4983_s1 + $0x40] sm:$0xff]  ;;  %v1093_v26 = vld [vmem:[%s4983_s1 + $0x48] sm:$0xff]  ;;  %s4936_s15 = scalar_lea.sflag [#allocation4], %s199_s29  ;;  %s3325_s10 = scalar_lea.vmem %s4929_s7, 4096 }
  0x1c   : > { %v2900_v24 = vpack.c.bf16 %v1123_v22, %v1122_v21  ;;  %v1124_v27 = vld [vmem:[%s4983_s1 + $0x140] sm:$0xff]  ;;  %v1125_v28 = vld [vmem:[%s4983_s1 + $0x148] sm:$0xff]  ;;  %v2855_v29 = vpack.c.bf16 %v1093_v26, %v1092_v25  ;;  %v1094_v31 = vld [vmem:[%s4983_s1 + $0x50] sm:$0xff]  ;;  %s3571_s27 = scalar_lea.vmem %s4982_s0, %s3266_s6  ;;  %p3326_p12 = scmp.ne.s32.totalorder %s4929_s7, %s3325_s10 }
  0x1d   : > { %2847 = vmatpush1.bf16.msra.mxu1 %v2846_v11  ;;  %v2903_v30 = vpack.c.bf16 %v1125_v28, %v1124_v27  ;;  %v1095_v32 = vld [vmem:[%s4983_s1 + $0x58] sm:$0xff]  ;;  %v1126_v33 = vld [vmem:[%s4983_s1 + $0x150] sm:$0xff]  ;;  %v1096_v37 = vld [vmem:[%s4983_s1 + $0x60] sm:$0xff]  ;;  %s3406_s11 = smov [#allocation3]  }
  0x1e   : > { %2895 = vmatpush1.bf16.msra.mxu0 %v2894_v12  ;;  %2848 = vmatprep.subr.bf16.mxu1 %v4986_v3  ;;  %v1127_v34 = vld [vmem:[%s4983_s1 + $0x158] sm:$0xff]  ;;  %v2858_v35 = vpack.c.bf16 %v1095_v32, %v1094_v31  ;;  %v1097_v38 = vld [vmem:[%s4983_s1 + $0x68] sm:$0xff]  ;;  %v1128_v39 = vld [vmem:[%s4983_s1 + $0x160] sm:$0xff]  ;;  %p3327_p13 = pnand %p3326_p12, %p3469_p4  ;;  %s3329_s18 = sshll.u32 %s3406_s11, 4  ;;  %s3330_s18 = int_to_ptr.vmem [resolvable:$false] %s3329_s18 }
  0x1f   : > { %2896 = vmatprep.subr.bf16.mxu0 %v4986_v3  ;;  %v2906_v36 = vpack.c.bf16 %v1127_v34, %v1126_v33  ;;  %v1129_v40 = vld [vmem:[%s4983_s1 + $0x168] sm:$0xff]  ;;  %v3589_v42 = vld [vmem:[%s3571_s27 + $0x18] sm:$0xff]  ;;  %v2861_v43 = vpack.c.bf16 %v1097_v38, %v1096_v37  ;;  %v1098_v45 = vld [vmem:[%s4983_s1 + $0x70] sm:$0xff]  ;;  %s3331_s19 = scalar_lea.vmem %s3330_s18, 8192  ;;  %p3332_p1 = scmp.lt.s32.totalorder %s4929_s7, %s3330_s18 }
  0x20   : > { %v282_v41 = vld [vmem:[%s3571_s27 + $0x1] sm:$0xff]  ;;  %1524 = vmatprep.mubr.f32.mxu0 %v3589_v42  ;;  %v2909_v44 = vpack.c.bf16 %v1129_v40, %v1128_v39  ;;  %v1099_v46 = vld [vmem:[%s4983_s1 + $0x78] sm:$0xff]  ;;  %v1130_v47 = vld [vmem:[%s4983_s1 + $0x170] sm:$0xff]  ;;  %p3328_p0 = pneg %p3327_p13  ;;  %p3333_p2 = scmp.lt.s32.totalorder %s3331_s19, %s3325_s10 }
  0x21   : > { %2850 = vmatpush1.bf16.msra.mxu1 %v2849_v17  ;;  %1299 = vmatprep.mubr.f32.mxu1 %v282_v41  ;;  %v1131_v48 = vld [vmem:[%s4983_s1 + $0x178] sm:$0xff]  ;;  %v2864_v49 = vpack.c.bf16 %v1099_v46, %v1098_v45  ;;  %v1100_v51 = vld [vmem:[%s4983_s1 + $0x80] sm:$0xff]  ;;  %v1101_v52 = vld [vmem:[%s4983_s1 + $0x88] sm:$0xff] }
  0x22   : > { %2898 = vmatpush1.bf16.msra.mxu0 %v2897_v18  ;;  %2851 = vmatprep.subr.bf16.mxu1 %v4986_v3  ;;  %v2912_v50 = vpack.c.bf16 %v1131_v48, %v1130_v47  ;;  %v1132_v53 = vld [vmem:[%s4983_s1 + $0x180] sm:$0xff]  ;;  %v1133_v54 = vld [vmem:[%s4983_s1 + $0x188] sm:$0xff]  ;;  %v2867_v55 = vpack.c.bf16 %v1101_v52, %v1100_v51  ;;  %v1102_v57 = vld [vmem:[%s4983_s1 + $0x90] sm:$0xff]  ;;  %p3334_p3 = por %p3333_p2, %p3332_p1 }
  0x23   : > { %2899 = vmatprep.subr.bf16.mxu0 %v4986_v3  ;;  %v2915_v56 = vpack.c.bf16 %v1133_v54, %v1132_v53  ;;  %v1103_v58 = vld [vmem:[%s4983_s1 + $0x98] sm:$0xff]  ;;  %v1134_v59 = vld [vmem:[%s4983_s1 + $0x190] sm:$0xff]  ;;  %v1104_v63 = vld [vmem:[%s4983_s1 + $0xa0] sm:$0xff] }
  0x24   : > { %v1135_v60 = vld [vmem:[%s4983_s1 + $0x198] sm:$0xff]  ;;  %v2870_v61 = vpack.c.bf16 %v1103_v58, %v1102_v57  ;;  %v1105_v0 = vld [vmem:[%s4983_s1 + $0xa8] sm:$0xff]  ;;  %v1136_v1 = vld [vmem:[%s4983_s1 + $0x1a0] sm:$0xff]  ;;  %p3335_p5 = pnand %p3334_p3, %p3328_p0 }
  0x25   : > { %2853 = vmatpush1.bf16.msra.mxu1 %v2852_v23  ;;  %v2918_v62 = vpack.c.bf16 %v1135_v60, %v1134_v59  ;;  %v1137_v2 = vld [vmem:[%s4983_s1 + $0x1a8] sm:$0xff]  ;;  %v2873_v4 = vpack.c.bf16 %v1105_v0, %v1104_v63  ;;  %v1106_v6 = vld [vmem:[%s4983_s1 + $0xb0] sm:$0xff]  ;;  %v1107_v7 = vld [vmem:[%s4983_s1 + $0xb8] sm:$0xff] }
  0x26   : > { %2901 = vmatpush1.bf16.msra.mxu0 %v2900_v24  ;;  %2854 = vmatprep.subr.bf16.mxu1 %v4986_v3  ;;  %v2921_v5 = vpack.c.bf16 %v1137_v2, %v1136_v1  ;;  %v1138_v8 = vld [vmem:[%s4983_s1 + $0x1b0] sm:$0xff]  ;;  %v1139_v9 = vld [vmem:[%s4983_s1 + $0x1b8] sm:$0xff]  ;;  %v2876_v10 = vpack.c.bf16 %v1107_v7, %v1106_v6  ;;  %v1108_v12 = vld [vmem:[%s4983_s1 + $0xc0] sm:$0xff] }
  0x27   : > { %2902 = vmatprep.subr.bf16.mxu0 %v4986_v3  ;;  %v2924_v11 = vpack.c.bf16 %v1139_v9, %v1138_v8  ;;  %v1109_v13 = vld [vmem:[%s4983_s1 + $0xc8] sm:$0xff]  ;;  %v1140_v14 = vld [vmem:[%s4983_s1 + $0x1c0] sm:$0xff]  ;;  %v1110_v18 = vld [vmem:[%s4983_s1 + $0xd0] sm:$0xff] }
  0x28   : > { %v1141_v15 = vld [vmem:[%s4983_s1 + $0x1c8] sm:$0xff]  ;;  %v2879_v16 = vpack.c.bf16 %v1109_v13, %v1108_v12  ;;  %v1111_v19 = vld [vmem:[%s4983_s1 + $0xd8] sm:$0xff]  ;;  %v1142_v20 = vld [vmem:[%s4983_s1 + $0x1d0] sm:$0xff] }
  0x29   : > { %2856 = vmatpush1.bf16.msra.mxu1 %v2855_v29  ;;  %v2927_v17 = vpack.c.bf16 %v1141_v15, %v1140_v14  ;;  %v1143_v21 = vld [vmem:[%s4983_s1 + $0x1d8] sm:$0xff]  ;;  %v2882_v22 = vpack.c.bf16 %v1111_v19, %v1110_v18  ;;  %v1112_v24 = vld [vmem:[%s4983_s1 + $0xe0] sm:$0xff]  ;;  %v1113_v25 = vld [vmem:[%s4983_s1 + $0xe8] sm:$0xff] }
  0x2a   : > { %2904 = vmatpush1.bf16.msra.mxu0 %v2903_v30  ;;  %2857 = vmatprep.subr.bf16.mxu1 %v4986_v3  ;;  %v2930_v23 = vpack.c.bf16 %v1143_v21, %v1142_v20  ;;  %v1144_v26 = vld [vmem:[%s4983_s1 + $0x1e0] sm:$0xff]  ;;  %v1145_v27 = vld [vmem:[%s4983_s1 + $0x1e8] sm:$0xff]  ;;  %v2885_v28 = vpack.c.bf16 %v1113_v25, %v1112_v24  ;;  %v1114_v30 = vld [vmem:[%s4983_s1 + $0xf0] sm:$0xff] }
  0x2b   : > { %2905 = vmatprep.subr.bf16.mxu0 %v4986_v3  ;;  %v2933_v29 = vpack.c.bf16 %v1145_v27, %v1144_v26  ;;  %v1115_v31 = vld [vmem:[%s4983_s1 + $0xf8] sm:$0xff]  ;;  %v1146_v32 = vld [vmem:[%s4983_s1 + $0x1f0] sm:$0xff]  ;;  %v1181_v37 = vld [vmem:[%s4983_s1 + $0x308] sm:$0xff] }
  0x2c   : > { %v1147_v33 = vld [vmem:[%s4983_s1 + $0x1f8] sm:$0xff]  ;;  %v2888_v34 = vpack.c.bf16 %v1115_v31, %v1114_v30  ;;  %v1148_v38 = vld [vmem:[%s4983_s1 + $0x200] sm:$0xff]  ;;  %v1149_v39 = vld [vmem:[%s4983_s1 + $0x208] sm:$0xff] }
  0x2d   : > { %2859 = vmatpush1.bf16.msra.mxu1 %v2858_v35  ;;  %v2936_v35 = vpack.c.bf16 %v1147_v33, %v1146_v32  ;;  %v218_v40 = vld [vmem:[%s3571_s27] sm:$0xff]  ;;  %v283_v45 = vld [vmem:[%s3571_s27 + $0x9] sm:$0xff]  ;;  %v1151_v47 = vld [vmem:[%s4983_s1 + $0x218] sm:$0xff] }
  0x2e   : > { %2907 = vmatpush1.bf16.msra.mxu0 %v2906_v36  ;;  %2860 = vmatprep.subr.bf16.mxu1 %v4986_v3  ;;  %v1180_v36 = vld [vmem:[%s4983_s1 + $0x300] sm:$0xff]  ;;  %v1150_v46 = vld [vmem:[%s4983_s1 + $0x210] sm:$0xff]  ;;  %v219_v51 = vld [vmem:[%s3571_s27 + $0x8] sm:$0xff] }
  0x2f   : > { %2908 = vmatprep.subr.bf16.mxu0 %v4986_v3  ;;  %v3733_v41 = vpack.c.bf16 %v1181_v37, %v1180_v36  ;;  %v2516_v48 = vld [vmem:[%s3571_s27 + $0x20] sm:$0xff]  ;;  %v347_v52 = vld [vmem:[%s3571_s27 + $0xa] sm:$0xff]  ;;  %v2942_v54 = vpack.c.bf16 %v1151_v47, %v1150_v46  ;;  %v2518_v0 = vld [vmem:[%s3571_s27 + $0x38] sm:$0xff] }
  0x30   : > { %v3756_v53 = vld [vmem:[%s3571_s27 + $0x19] sm:$0xff]  ;;  %v1153_v58 = vld [vmem:[%s4983_s1 + $0x228] sm:$0xff]  ;;  %v1154_v2 = vld [vmem:[%s4983_s1 + $0x230] sm:$0xff] }
  0x31   : > { %2862 = vmatpush1.bf16.msra.mxu1 %v2861_v43  ;;  %v346_v43 = vld [vmem:[%s3571_s27 + $0x2] sm:$0xff]  ;;  %v1187_v6 = vld [vmem:[%s4983_s1 + $0x338] sm:$0xff]  ;;  %v2520_v18 = vld [vmem:[%s3571_s27 + $0x50] sm:$0xff] }
  0x32   : > { %2910 = vmatpush1.bf16.msra.mxu0 %v2909_v44  ;;  %2863 = vmatprep.subr.bf16.mxu1 %v4986_v3  ;;  %v2939_v44 = vpack.c.bf16 %v1149_v39, %v1148_v38  ;;  %v1152_v57 = vld [vmem:[%s4983_s1 + $0x220] sm:$0xff]  ;;  %v1185_v60 = vld [vmem:[%s4983_s1 + $0x328] sm:$0xff]  ;;  %v3807_v8 = vld [vmem:[%s3571_s27 + $0x31] sm:$0xff] }
  0x33   : > { %2911 = vmatprep.subr.bf16.mxu0 %v4986_v3  ;;  %v1184_v59 = vld [vmem:[%s4983_s1 + $0x320] sm:$0xff]  ;;  %v2945_v63 = vpack.c.bf16 %v1153_v58, %v1152_v57  ;;  %v2519_v9 = vld [vmem:[%s3571_s27 + $0x48] sm:$0xff]  ;;  %v3830_v15 = vld [vmem:[%s3571_s27 + $0x32] sm:$0xff] }
  0x34   : > { %v3785_v1 = vpack.c.bf16 %v1185_v60, %v1184_v59  ;;  %v3804_v7 = vld [vmem:[%s3571_s27 + $0x22] sm:$0xff]  ;;  %v1158_v20 = vld [vmem:[%s4983_s1 + $0x250] sm:$0xff]  ;;  %v1159_v21 = vld [vmem:[%s4983_s1 + $0x258] sm:$0xff] }
  0x35   : > { %2865 = vmatpush1.bf16.msra.mxu1 %v2864_v49  ;;  %v1182_v49 = vld [vmem:[%s4983_s1 + $0x310] sm:$0xff]  ;;  %v1157_v12 = vld [vmem:[%s4983_s1 + $0x248] sm:$0xff]  ;;  %v1188_v13 = vld [vmem:[%s4983_s1 + $0x340] sm:$0xff]  ;;  %v2954_v26 = vpack.c.bf16 %v1159_v21, %v1158_v20 }
  0x36   : > { %2913 = vmatpush1.bf16.msra.mxu0 %v2912_v50  ;;  %2866 = vmatprep.subr.bf16.mxu1 %v4986_v3  ;;  %v1183_v50 = vld [vmem:[%s4983_s1 + $0x318] sm:$0xff]  ;;  %v1189_v14 = vld [vmem:[%s4983_s1 + $0x348] sm:$0xff]  ;;  %v2521_v27 = vld [vmem:[%s3571_s27 + $0x60] sm:$0xff] }
  0x37   : > { %2914 = vmatprep.subr.bf16.mxu0 %v4986_v3  ;;  %v3838_v19 = vpack.c.bf16 %v1189_v14, %v1188_v13  ;;  %v3856_v24 = vld [vmem:[%s3571_s27 + $0x3a] sm:$0xff]  ;;  %v3859_v25 = vld [vmem:[%s3571_s27 + $0x49] sm:$0xff] }
  0x38   : > { %v1161_v30 = vld [vmem:[%s4983_s1 + $0x268] sm:$0xff]  ;;  %v1192_v31 = vld [vmem:[%s4983_s1 + $0x360] sm:$0xff]  ;;  %v1162_v38 = vld [vmem:[%s4983_s1 + $0x270] sm:$0xff] }
  0x39   : > { %2868 = vmatpush1.bf16.msra.mxu1 %v2867_v55  ;;  %v2517_v55 = vld [vmem:[%s3571_s27 + $0x30] sm:$0xff]  ;;  %v1193_v32 = vld [vmem:[%s4983_s1 + $0x368] sm:$0xff]  ;;  %v1163_v39 = vld [vmem:[%s4983_s1 + $0x278] sm:$0xff] }
  0x3a   : > { %2916 = vmatpush1.bf16.msra.mxu0 %v2915_v56  ;;  %2869 = vmatprep.subr.bf16.mxu1 %v4986_v3  ;;  %v3760_v56 = vpack.c.bf16 %v1183_v50, %v1182_v49  ;;  %v3882_v33 = vld [vmem:[%s3571_s27 + $0x4a] sm:$0xff]  ;;  %v3890_v37 = vpack.c.bf16 %v1193_v32, %v1192_v31  ;;  %v2960_v46 = vpack.c.bf16 %v1163_v39, %v1162_v38  ;;  %v2523_v47 = vld [vmem:[%s3571_s27 + $0x78] sm:$0xff]  ;;  %v1164_v49 = vld [vmem:[%s4983_s1 + $0x280] sm:$0xff] }
  0x3b   : > { %2917 = vmatprep.subr.bf16.mxu0 %v4986_v3  ;;  %v2522_v36 = vld [vmem:[%s3571_s27 + $0x68] sm:$0xff]  ;;  %v2524_v58 = vld [vmem:[%s3571_s27 + $0x80] sm:$0xff]  ;;  %v1166_v60 = vld [vmem:[%s4983_s1 + $0x290] sm:$0xff] }
  0x3c   : > { %v1165_v50 = vld [vmem:[%s4983_s1 + $0x288] sm:$0xff]  ;;  %v1200_v13 = vld [vmem:[%s4983_s1 + $0x3a0] sm:$0xff]  ;;  %v3995_v21 = vld [vmem:[%s3571_s27 + $0x98] sm:$0xff] }
  0x3d   : > { %2871 = vmatpush1.bf16.msra.mxu1 %v2870_v61  ;;  %v3777_v61 = vld [vmem:[%s3571_s27 + $0x1a] sm:$0xff]  ;;  %v2963_v57 = vpack.c.bf16 %v1165_v50, %v1164_v49  ;;  %v1201_v14 = vld [vmem:[%s4983_s1 + $0x3a8] sm:$0xff]  ;;  %v4021_v31 = vld [vmem:[%s3571_s27 + $0x91] sm:$0xff] }
  0x3e   : > { %2919 = vmatpush1.bf16.msra.mxu0 %v2918_v62  ;;  %2872 = vmatprep.subr.bf16.mxu1 %v4986_v3  ;;  %v3780_v62 = vld [vmem:[%s3571_s27 + $0x21] sm:$0xff]  ;;  %v4053_v50 = vld [vmem:[%s3571_s27 + $0xb0] sm:$0xff] }
  0x3f   : > { %2920 = vmatprep.subr.bf16.mxu0 %v4986_v3  ;;  %v1172_v38 = vld [vmem:[%s4983_s1 + $0x2c0] sm:$0xff]  ;;  %v1173_v39 = vld [vmem:[%s4983_s1 + $0x2c8] sm:$0xff] }
  0x40   : > { %v2975_v49 = vpack.c.bf16 %v1173_v39, %v1172_v38  ;;  %v1178_v38 = vld [vmem:[%s4983_s1 + $0x2f0] sm:$0xff]  ;;  %v1179_v39 = vld [vmem:[%s4983_s1 + $0x2f8] sm:$0xff] }
  0x41   : > { %2874 = vmatpush1.bf16.msra.mxu1 %v2873_v4  ;;  %v1155_v4 = vld [vmem:[%s4983_s1 + $0x238] sm:$0xff] }
  0x42   : > { %2922 = vmatpush1.bf16.msra.mxu0 %v2921_v5  ;;  %2875 = vmatprep.subr.bf16.mxu1 %v4986_v3  ;;  %v1186_v5 = vld [vmem:[%s4983_s1 + $0x330] sm:$0xff] }
  0x43   : > { %2923 = vmatprep.subr.bf16.mxu0 %v4986_v3 }
  0x45   : > { %2877 = vmatpush1.bf16.msra.mxu1 %v2876_v10  ;;  %v3812_v10 = vpack.c.bf16 %v1187_v6, %v1186_v5  ;;  %v3963_v5 = vld [vmem:[%s3571_s27 + $0x79] sm:$0xff] }
  0x46   : > { %2925 = vmatpush1.bf16.msra.mxu0 %v2924_v11  ;;  %2878 = vmatprep.subr.bf16.mxu1 %v4986_v3  ;;  %v1156_v11 = vld [vmem:[%s4983_s1 + $0x240] sm:$0xff] }
  0x47   : > { %2926 = vmatprep.subr.bf16.mxu0 %v4986_v3 }
  0x49   : > { %2880 = vmatpush1.bf16.msra.mxu1 %v2879_v16  ;;  %v3833_v16 = vld [vmem:[%s3571_s27 + $0x39] sm:$0xff] }
  0x4a   : > { %2928 = vmatpush1.bf16.msra.mxu0 %v2927_v17  ;;  %2881 = vmatprep.subr.bf16.mxu1 %v4986_v3  ;;  %v2951_v17 = vpack.c.bf16 %v1157_v12, %v1156_v11  ;;  %v1168_v11 = vld [vmem:[%s4983_s1 + $0x2a0] sm:$0xff]  ;;  %v1169_v12 = vld [vmem:[%s4983_s1 + $0x2a8] sm:$0xff] }
  0x4b   : > { %2929 = vmatprep.subr.bf16.mxu0 %v4986_v3  ;;  %v2969_v20 = vpack.c.bf16 %v1169_v12, %v1168_v11  ;;  %v1176_v12 = vld [vmem:[%s4983_s1 + $0x2e0] sm:$0xff] }
  0x4d   : > { %2883 = vmatpush1.bf16.msra.mxu1 %v2882_v22  ;;  %v1190_v22 = vld [vmem:[%s4983_s1 + $0x350] sm:$0xff] }
  0x4e   : > { %2931 = vmatpush1.bf16.msra.mxu0 %v2930_v23  ;;  %2884 = vmatprep.subr.bf16.mxu1 %v4986_v3  ;;  %v1191_v23 = vld [vmem:[%s4983_s1 + $0x358] sm:$0xff] }
  0x4f   : > { %2932 = vmatprep.subr.bf16.mxu0 %v4986_v3 }
  0x51   : > { %2886 = vmatpush1.bf16.msra.mxu1 %v2885_v28  ;;  %v3864_v28 = vpack.c.bf16 %v1191_v23, %v1190_v22  ;;  %v3999_v22 = vpack.c.bf16 %v1201_v14, %v1200_v13  ;;  %v1170_v23 = vld [vmem:[%s4983_s1 + $0x2b0] sm:$0xff]  ;;  %v1177_v13 = vld [vmem:[%s4983_s1 + $0x2e8] sm:$0xff]  ;;  %v1208_v14 = vld [vmem:[%s4983_s1 + $0x3e0] sm:$0xff] }
  0x52   : > { %2934 = vmatpush1.bf16.msra.mxu0 %v2933_v29  ;;  %2887 = vmatprep.subr.bf16.mxu1 %v4986_v3  ;;  %v1160_v29 = vld [vmem:[%s4983_s1 + $0x260] sm:$0xff] }
  0x53   : > { %2935 = vmatprep.subr.bf16.mxu0 %v4986_v3  ;;  %5047 = vst [vmem:[#allocation6_spill] sm:$0xff] %v3999_v22 }
  0x55   : > { %2889 = vmatpush1.bf16.msra.mxu1 %v2888_v34  ;;  %v3885_v34 = vld [vmem:[%s3571_s27 + $0x51] sm:$0xff] }
  0x56   : > { %2937 = vmatpush1.bf16.msra.mxu0 %v2936_v35  ;;  %3066 = vmatprep.subr.bf16.mxu1 %v4986_v3  ;;  %v2957_v35 = vpack.c.bf16 %v1161_v30, %v1160_v29  ;;  %v1203_v29 = vld [vmem:[%s4983_s1 + $0x3b8] sm:$0xff]  ;;  %v4018_v30 = vld [vmem:[%s3571_s27 + $0x82] sm:$0xff] }
  0x57   : > { %2938 = vmatprep.subr.bf16.mxu0 %v4986_v3 }
  0x58   : > { %1300 = vmatmul.mubr.f32.vlgmr.msra.gmra.mrb[0].mxu1 %v218_v40  ;;  %v1194_v40 = vld [vmem:[%s4983_s1 + $0x370] sm:$0xff] }
  0x59   : > { %1525 = vmatmul.mubr.f32.vlgmr.msra.gmra.mrb[0].mxu0 %v346_v43  ;;  %3082 = vmatpush1.bf16.msra.mxu1 %v3733_v41  ;;  %v1195_v43 = vld [vmem:[%s4983_s1 + $0x378] sm:$0xff] }
  0x5a   : > { %2940 = vmatpush1.bf16.msra.mxu0 %v2939_v44  ;;  %1304 = vmatprep.mubr.f32.mxu1 %v283_v45  ;;  %v3908_v44 = vld [vmem:[%s3571_s27 + $0x52] sm:$0xff]  ;;  %v3911_v45 = vld [vmem:[%s3571_s27 + $0x61] sm:$0xff] }
  0x5b   : > { %1529 = vmatprep.mubr.f32.mxu0 %v2516_v48  ;;  %2941 = vmatprep.subr.bf16.mxu0 %v4986_v3 }
  0x5c   : > { %1305 = vmatmul.mubr.f32.gmra.mrb[2].mxu1 %v219_v51  ;;  %3067 = vmatprep.subr.bf16.mxu1 %v4986_v3  ;;  %v1196_v51 = vld [vmem:[%s4983_s1 + $0x380] sm:$0xff] }
  0x5d   : > { %1530 = vmatmul.mubr.f32.gmra.mrb[2].mxu0 %v347_v52  ;;  %1309 = vmatprep.mubr.f32.mxu1 %v3756_v53  ;;  %v1197_v52 = vld [vmem:[%s4983_s1 + $0x388] sm:$0xff] }
  0x5e   : > { %1534 = vmatprep.mubr.f32.mxu0 %v2517_v55  ;;  %2943 = vmatpush1.bf16.msra.mxu0 %v2942_v54  ;;  %v3934_v54 = vld [vmem:[%s3571_s27 + $0x62] sm:$0xff]  ;;  %v3942_v59 = vpack.c.bf16 %v1197_v52, %v1196_v51  ;;  %v1174_v52 = vld [vmem:[%s4983_s1 + $0x2d0] sm:$0xff] }
  0x5f   : > { %3083 = vmatpush1.bf16.msra.mxu1 %v3760_v56  ;;  %2944 = vmatprep.subr.bf16.mxu0 %v4986_v3 }
  0x60   : > { %1310 = vmatmul.mubr.f32.gmra.mrb[4].mxu1 %v3589_v42  ;;  %3068 = vmatprep.subr.bf16.mxu1 %v4986_v3  ;;  %v2948_v42 = vpack.c.bf16 %v1155_v4, %v1154_v2  ;;  %v1199_v2 = vld [vmem:[%s4983_s1 + $0x398] sm:$0xff]  ;;  %v3960_v4 = vld [vmem:[%s3571_s27 + $0x6a] sm:$0xff] }
  0x61   : > { %1535 = vmatmul.mubr.f32.gmra.mrb[4].mxu0 %v3777_v61  ;;  %1314 = vmatprep.mubr.f32.mxu1 %v3780_v62 }
  0x62   : > { %1539 = vmatprep.mubr.f32.mxu0 %v2518_v0  ;;  %2946 = vmatpush1.bf16.msra.mxu0 %v2945_v63  ;;  %v1167_v63 = vld [vmem:[%s4983_s1 + $0x298] sm:$0xff] }
  0x63   : > { %3084 = vmatpush1.bf16.msra.mxu1 %v3785_v1  ;;  %2947 = vmatprep.subr.bf16.mxu0 %v4986_v3  ;;  %v2966_v6 = vpack.c.bf16 %v1167_v63, %v1166_v60  ;;  %v1207_v60 = vld [vmem:[%s4983_s1 + $0x3d8] sm:$0xff] }
  0x64   : > { %1315 = vmatmul.mubr.f32.gmra.mrb[6].mxu1 %v2516_v48  ;;  %3069 = vmatprep.subr.bf16.mxu1 %v4986_v3  ;;  %v3916_v48 = vpack.c.bf16 %v1195_v43, %v1194_v40  ;;  %v1204_v40 = vld [vmem:[%s4983_s1 + $0x3c0] sm:$0xff]  ;;  %v1205_v43 = vld [vmem:[%s4983_s1 + $0x3c8] sm:$0xff] }
  0x65   : > { %1540 = vmatmul.mubr.f32.gmra.mrb[6].mxu0 %v3804_v7  ;;  %1319 = vmatprep.mubr.f32.mxu1 %v3807_v8  ;;  %v4057_v51 = vpack.c.bf16 %v1205_v43, %v1204_v40  ;;  %v4077_v63 = vld [vmem:[%s3571_s27 + $0x9a] sm:$0xff]  ;;  %v1210_v40 = vld [vmem:[%s4983_s1 + $0x3f0] sm:$0xff] }
  0x66   : > { %1544 = vmatprep.mubr.f32.mxu0 %v2519_v9  ;;  %2949 = vmatpush1.bf16.msra.mxu0 %v2948_v42  ;;  %v3966_v42 = vld [vmem:[%s3571_s27 + $0x90] sm:$0xff]  ;;  %5050 = vst [vmem:[#allocation9_spill] sm:$0xff] %v4077_v63  ;;  %v1211_v43 = vld [vmem:[%s4983_s1 + $0x3f8] sm:$0xff] }
  0x67   : > { %3085 = vmatpush1.bf16.msra.mxu1 %v3812_v10  ;;  %2950 = vmatprep.subr.bf16.mxu0 %v4986_v3  ;;  %5049 = vst [vmem:[#allocation8_spill] sm:$0xff] %v4057_v51 }
  0x68   : > { %1320 = vmatmul.mubr.f32.gmra.mrb[8].mxu1 %v2517_v55  ;;  %3070 = vmatprep.subr.bf16.mxu1 %v4986_v3  ;;  %v3937_v55 = vld [vmem:[%s3571_s27 + $0x69] sm:$0xff] }
  0x69   : > { %1545 = vmatmul.mubr.f32.gmra.mrb[8].mxu0 %v3830_v15  ;;  %1324 = vmatprep.mubr.f32.mxu1 %v3833_v16 }
  0x6a   : > { %1549 = vmatprep.mubr.f32.mxu0 %v2520_v18  ;;  %2952 = vmatpush1.bf16.msra.mxu0 %v2951_v17  ;;  %v3989_v17 = vld [vmem:[%s3571_s27 + $0x7a] sm:$0xff] }
  0x6b   : > { %3086 = vmatpush1.bf16.msra.mxu1 %v3838_v19  ;;  %2953 = vmatprep.subr.bf16.mxu0 %v4986_v3 }
  0x6c   : > { %1325 = vmatmul.mubr.f32.gmra.mrb[10].mxu1 %v2518_v0  ;;  %3071 = vmatprep.subr.bf16.mxu1 %v4986_v3  ;;  %v1198_v0 = vld [vmem:[%s4983_s1 + $0x390] sm:$0xff] }
  0x6d   : > { %1550 = vmatmul.mubr.f32.gmra.mrb[10].mxu0 %v3856_v24  ;;  %1329 = vmatprep.mubr.f32.mxu1 %v3859_v25 }
  0x6e   : > { %1554 = vmatprep.mubr.f32.mxu0 %v2521_v27  ;;  %2955 = vmatpush1.bf16.msra.mxu0 %v2954_v26  ;;  %v1171_v26 = vld [vmem:[%s4983_s1 + $0x2b8] sm:$0xff] }
  0x6f   : > { %3087 = vmatpush1.bf16.msra.mxu1 %v3864_v28  ;;  %2956 = vmatprep.subr.bf16.mxu0 %v4986_v3  ;;  %v2972_v32 = vpack.c.bf16 %v1171_v26, %v1170_v23  ;;  %v4107_v23 = vld [vmem:[%s3571_s27 + $0xaa] sm:$0xff] }
  0x70   : > { %1330 = vmatmul.mubr.f32.gmra.mrb[12].mxu1 %v2519_v9  ;;  %3072 = vmatprep.subr.bf16.mxu1 %v4986_v3  ;;  %v3970_v9 = vpack.c.bf16 %v1199_v2, %v1198_v0  ;;  %v4080_v0 = vld [vmem:[%s3571_s27 + $0xa9] sm:$0xff]  ;;  %5052 = vst [vmem:[#allocation11_spill] sm:$0xff] %v4107_v23  ;;  %v4110_v26 = vld [vmem:[%s3571_s27 + $0xb1] sm:$0xff] }
  0x71   : > { %1555 = vmatmul.mubr.f32.gmra.mrb[12].mxu0 %v3882_v33  ;;  %1334 = vmatprep.mubr.f32.mxu1 %v3885_v34 }
  0x72   : > { %1559 = vmatprep.mubr.f32.mxu0 %v2522_v36  ;;  %2958 = vmatpush1.bf16.msra.mxu0 %v2957_v35  ;;  %v4024_v35 = vld [vmem:[%s3571_s27 + $0xa8] sm:$0xff] }
  0x73   : > { %3088 = vmatpush1.bf16.msra.mxu1 %v3890_v37  ;;  %2959 = vmatprep.subr.bf16.mxu0 %v4986_v3 }
  0x74   : > { %1335 = vmatmul.mubr.f32.gmra.mrb[14].mxu1 %v2520_v18  ;;  %3073 = vmatprep.subr.bf16.mxu1 %v4986_v3  ;;  %v3992_v18 = vld [vmem:[%s3571_s27 + $0x81] sm:$0xff] }
  0x75   : > { %1560 = vmatmul.mubr.f32.gmra.mrb[14].mxu0 %v3908_v44  ;;  %1339 = vmatprep.mubr.f32.mxu1 %v3911_v45 }
  0x76   : > { %1564 = vmatprep.mubr.f32.mxu0 %v2523_v47  ;;  %2961 = vmatpush1.bf16.msra.mxu0 %v2960_v46  ;;  %v4047_v46 = vld [vmem:[%s3571_s27 + $0x92] sm:$0xff] }
  0x77   : > { %3089 = vmatpush1.bf16.msra.mxu1 %v3916_v48  ;;  %2962 = vmatprep.subr.bf16.mxu0 %v4986_v3 }
  0x78   : > { %1340 = vmatmul.mubr.f32.gmra.mrb[16].mxu1 %v2521_v27  ;;  %3074 = vmatprep.subr.bf16.mxu1 %v4986_v3  ;;  %v1202_v27 = vld [vmem:[%s4983_s1 + $0x3b0] sm:$0xff] }
  0x79   : > { %1565 = vmatmul.mubr.f32.gmra.mrb[16].mxu0 %v3934_v54  ;;  %1344 = vmatprep.mubr.f32.mxu1 %v3937_v55 }
  0x7a   : > { %1569 = vmatprep.mubr.f32.mxu0 %v2524_v58  ;;  %2964 = vmatpush1.bf16.msra.mxu0 %v2963_v57  ;;  %v1175_v57 = vld [vmem:[%s4983_s1 + $0x2d8] sm:$0xff] }
  0x7b   : > { %3090 = vmatpush1.bf16.msra.mxu1 %v3942_v59  ;;  %2965 = vmatprep.subr.bf16.mxu0 %v4986_v3  ;;  %v2978_v2 = vpack.c.bf16 %v1175_v57, %v1174_v52  ;;  %v1213_v52 = vld [vmem:[%s4983_s1 + $0x408] sm:$0xff]  ;;  %v4143_v57 = vld [vmem:[%s3571_s27 + $0xb2] sm:$0xff] }
  0x7c   : > { %1345 = vmatmul.mubr.f32.gmra.mrb[18].mxu1 %v2522_v36  ;;  %3075 = vmatprep.subr.bf16.mxu1 %v4986_v3  ;;  %v4028_v36 = vpack.c.bf16 %v1203_v29, %v1202_v27  ;;  %v2981_v27 = vpack.c.bf16 %v1177_v13, %v1176_v12  ;;  %v4113_v29 = vld [vmem:[%s3571_s27 + $0xc8] sm:$0xff]  ;;  %5054 = vst [vmem:[#allocation13_spill] sm:$0xff] %v4143_v57 }
  0x7d   : > { %1570 = vmatmul.mubr.f32.gmra.mrb[18].mxu0 %v3960_v4  ;;  %1349 = vmatprep.mubr.f32.mxu1 %v3963_v5  ;;  %v4153_v12 = vpack.c.bf16 %v1211_v43, %v1210_v40  ;;  %v4185_v40 = vld [vmem:[%s3571_s27 + $0xf0] sm:$0xff]  ;;  %v4192_v43 = vld [vmem:[%s3571_s27 + $0xda] sm:$0xff] }
  0x7e   : > { %1574 = vmatprep.mubr.f32.mxu0 %v3966_v42  ;;  %2967 = vmatpush1.bf16.msra.mxu0 %v2966_v6  ;;  %5048 = vst [vmem:[#allocation7_spill] sm:$0xff] %v4028_v36  ;;  %v4083_v6 = vld [vmem:[%s3571_s27 + $0xc0] sm:$0xff]  ;;  %5058 = vst [vmem:[#allocation17_spill] sm:$0xff] %v4192_v43 }
  0x7f   : > { %3091 = vmatpush1.bf16.msra.mxu1 %v3970_v9  ;;  %2968 = vmatprep.subr.bf16.mxu0 %v4986_v3  ;;  %5055 = vst [vmem:[#allocation14_spill] sm:$0xff] %v4153_v12 }
  0x80   : > { %1350 = vmatmul.mubr.f32.gmra.mrb[20].mxu1 %v2523_v47  ;;  %3076 = vmatprep.subr.bf16.mxu1 %v4986_v3  ;;  %v4050_v47 = vld [vmem:[%s3571_s27 + $0x99] sm:$0xff] }
  0x81   : > { %1575 = vmatmul.mubr.f32.gmra.mrb[20].mxu0 %v3989_v17  ;;  %1354 = vmatprep.mubr.f32.mxu1 %v3992_v18 }
  0x82   : > { %1579 = vmatprep.mubr.f32.mxu0 %v3995_v21  ;;  %2970 = vmatpush1.bf16.msra.mxu0 %v2969_v20  ;;  %v1209_v20 = vld [vmem:[%s4983_s1 + $0x3e8] sm:$0xff] }
  0x83   : > { %3092 = vmatpush1.bf16.msra.mxu1 %v3999_v22  ;;  %2971 = vmatprep.subr.bf16.mxu0 %v4986_v3  ;;  %v4273_v22 = vld [vmem:[%s3571_s27 + $0x129] sm:$0xff] }
  0x84   : > { %1355 = vmatmul.mubr.f32.gmra.mrb[22].mxu1 %v2524_v58  ;;  %3077 = vmatprep.subr.bf16.mxu1 %v4986_v3  ;;  %v1206_v58 = vld [vmem:[%s4983_s1 + $0x3d0] sm:$0xff]  ;;  %5070 = vst [vmem:[#allocation29_spill] sm:$0xff] %v4273_v22 }
  0x85   : > { %1580 = vmatmul.mubr.f32.gmra.mrb[22].mxu0 %v4018_v30  ;;  %1359 = vmatprep.mubr.f32.mxu1 %v4021_v31  ;;  %v4087_v11 = vpack.c.bf16 %v1207_v60, %v1206_v58  ;;  %v4146_v58 = vld [vmem:[%s3571_s27 + $0xc1] sm:$0xff]  ;;  %v2984_v60 = vpack.c.bf16 %v1179_v39, %v1178_v38  ;;  %v4179_v38 = vld [vmem:[%s3571_s27 + $0xca] sm:$0xff]  ;;  %v4182_v39 = vld [vmem:[%s3571_s27 + $0xd9] sm:$0xff] }
  0x86   : > { %1584 = vmatprep.mubr.f32.mxu0 %v4024_v35  ;;  %2973 = vmatpush1.bf16.msra.mxu0 %v2972_v32  ;;  %v4117_v32 = vpack.c.bf16 %v1209_v20, %v1208_v14  ;;  %v4163_v14 = vld [vmem:[%s3571_s27 + $0xc2] sm:$0xff]  ;;  %5057 = vst [vmem:[#allocation16_spill] sm:$0xff] %v4179_v38 }
  0x87   : > { %3093 = vmatpush1.bf16.msra.mxu1 %v4028_v36  ;;  %2974 = vmatprep.subr.bf16.mxu0 %v4986_v3  ;;  %5051 = vst [vmem:[#allocation10_spill] sm:$0xff] %v4087_v11  ;;  %5056 = vst [vmem:[#allocation15_spill] sm:$0xff] %v4163_v14  ;;  %v4166_v20 = vld [vmem:[%s3571_s27 + $0xc9] sm:$0xff]  ;;  %v4260_v36 = vld [vmem:[%s3571_s27 + $0x121] sm:$0xff] }
  0x88   : > { %1360 = vmatmul.mubr.f32.gmra.mrb[24].mxu1 %v3966_v42  ;;  %3078 = vmatprep.subr.bf16.mxu1 %v4986_v3  ;;  %5053 = vst [vmem:[#allocation12_spill] sm:$0xff] %v4117_v32  ;;  %5067 = vst [vmem:[#allocation26_spill] sm:$0xff] %v4260_v36 }
  0x89   : > { %1585 = vmatmul.mubr.f32.gmra.mrb[24].mxu0 %v4047_v46  ;;  %1364 = vmatprep.mubr.f32.mxu1 %v4050_v47 }
  0x8a   : > { %1589 = vmatprep.mubr.f32.mxu0 %v4053_v50  ;;  %2976 = vmatpush1.bf16.msra.mxu0 %v2975_v49  ;;  %v1212_v49 = vld [vmem:[%s4983_s1 + $0x400] sm:$0xff] }
  0x8b   : > { %3094 = vmatpush1.bf16.msra.mxu1 %v4057_v51  ;;  %2977 = vmatprep.subr.bf16.mxu0 %v4986_v3  ;;  %v4157_v13 = vpack.c.bf16 %v1213_v52, %v1212_v49  ;;  %v4195_v49 = vld [vmem:[%s3571_s27 + $0xe1] sm:$0xff]  ;;  %v4198_v52 = vld [vmem:[%s3571_s27 + $0xf8] sm:$0xff] }
  0x8c   : > { %1365 = vmatmul.mubr.f32.gmra.mrb[26].mxu1 %v3995_v21  ;;  %3079 = vmatprep.subr.bf16.mxu1 %v4986_v3  ;;  %v4247_v51 = vld [vmem:[%s3571_s27 + $0x111] sm:$0xff] }
  0x8d   : > { %1590 = vmatmul.mubr.f32.gmra.mrb[26].mxu0 %v4077_v63  ;;  %1369 = vmatprep.mubr.f32.mxu1 %v4080_v0  ;;  %v4276_v63 = vld [vmem:[%s3571_s27 + $0x140] sm:$0xff] }
  0x8e   : > { %1594 = vmatprep.mubr.f32.mxu0 %v4083_v6  ;;  %2979 = vmatpush1.bf16.msra.mxu0 %v2978_v2  ;;  %v4149_v2 = vld [vmem:[%s3571_s27 + $0xd8] sm:$0xff]  ;;  %5071 = vst [vmem:[#allocation30_spill] sm:$0xff] %v4276_v63 }
  0x8f   : > { %3095 = vmatpush1.bf16.msra.mxu1 %v4087_v11  ;;  %2980 = vmatprep.subr.bf16.mxu0 %v4986_v3  ;;  %v4234_v11 = vld [vmem:[%s3571_s27 + $0x109] sm:$0xff] }
  0x90   : > { %1370 = vmatmul.mubr.f32.gmra.mrb[28].mxu1 %v4024_v35  ;;  %3080 = vmatprep.subr.bf16.mxu1 %v4986_v3 }
  0x91   : > { %1595 = vmatmul.mubr.f32.gmra.mrb[28].mxu0 %v4107_v23  ;;  %1374 = vmatprep.mubr.f32.mxu1 %v4110_v26  ;;  %v4263_v23 = vld [vmem:[%s3571_s27 + $0x138] sm:$0xff] }
  0x92   : > { %1599 = vmatprep.mubr.f32.mxu0 %v4113_v29  ;;  %2982 = vmatpush1.bf16.msra.mxu0 %v2981_v27  ;;  %v4169_v27 = vld [vmem:[%s3571_s27 + $0xe0] sm:$0xff]  ;;  %5068 = vst [vmem:[#allocation27_spill] sm:$0xff] %v4263_v23 }
  0x93   : > { %3096 = vmatpush1.bf16.msra.mxu1 %v4117_v32  ;;  %2983 = vmatprep.subr.bf16.mxu0 %v4986_v3  ;;  %v4221_v32 = vld [vmem:[%s3571_s27 + $0xf9] sm:$0xff] }
  0x94   : > { %1375 = vmatmul.mubr.f32.gmra.mrb[30].mxu1 %v4053_v50  ;;  %3081 = vmatprep.subr.bf16.mxu1 %v4986_v3 }
  0x95   : > { %1600 = vmatmul.mubr.f32.gmra.mrb[30].mxu0 %v4143_v57  ;;  %1379 = vmatprep.mubr.f32.mxu1 %v4146_v58  ;;  %v4250_v57 = vld [vmem:[%s3571_s27 + $0x128] sm:$0xff] }
  0x96   : > { %1604 = vmatprep.mubr.f32.mxu0 %v4149_v2  ;;  %2985 = vmatpush1.bf16.msra.mxu0 %v2984_v60  ;;  %v4205_v60 = vld [vmem:[%s3571_s27 + $0xe2] sm:$0xff]  ;;  %5065 = vst [vmem:[#allocation24_spill] sm:$0xff] %v4250_v57 }
  0x97   : > { %3097 = vmatpush1.bf16.msra.mxu1 %v4153_v12  ;;  %2986 = vmatprep.subr.bf16.mxu0 %v4986_v3  ;;  %5059 = vst [vmem:[#allocation18_spill] sm:$0xff] %v4205_v60  ;;  %v4208_v3 = vld [vmem:[%s3571_s27 + $0xf1] sm:$0xff]  ;;  %v4211_v12 = vld [vmem:[%s3571_s27 + $0x108] sm:$0xff] }
  0x98   : > { %1380 = vmatmul.mubr.f32.gmra.mrb[32].mxu1 %v4083_v6  ;;  %3035 = vmatprep.subr.bf16.mxu1 %v4157_v13 }
  0x99   : > { %1605 = vmatmul.mubr.f32.gmra.mrb[32].mxu0 %v4163_v14  ;;  %1384 = vmatprep.mubr.f32.mxu1 %v4166_v20  ;;  %v4237_v14 = vld [vmem:[%s3571_s27 + $0x120] sm:$0xff] }
  0x9a   : > { %1609 = vmatprep.mubr.f32.mxu0 %v4169_v27  ;;  %5063 = vst [vmem:[#allocation22_spill] sm:$0xff] %v4237_v14 }
  0x9c   : > { %1385 = vmatmul.mubr.f32.gmra.mrb[34].mxu1 %v4113_v29 }
  0x9d   : > { %1610 = vmatmul.mubr.f32.gmra.mrb[34].mxu0 %v4179_v38  ;;  %1389 = vmatprep.mubr.f32.mxu1 %v4182_v39  ;;  %v4224_v38 = vld [vmem:[%s3571_s27 + $0x110] sm:$0xff] }
  0x9e   : > { %1614 = vmatprep.mubr.f32.mxu0 %v4185_v40  ;;  %5061 = vst [vmem:[#allocation20_spill] sm:$0xff] %v4224_v38 }
  0xa0   : > { %1390 = vmatmul.mubr.f32.gmra.mrb[36].mxu1 %v4149_v2 }
  0xa1   : > { %1615 = vmatmul.mubr.f32.gmra.mrb[36].mxu0 %v4192_v43  ;;  %1394 = vmatprep.mubr.f32.mxu1 %v4195_v49  ;;  %v4218_v43 = vld [vmem:[%s3571_s27 + $0xf2] sm:$0xff] }
  0xa2   : > { %1619 = vmatprep.mubr.f32.mxu0 %v4198_v52  ;;  %5060 = vst [vmem:[#allocation19_spill] sm:$0xff] %v4218_v43 }
  0xa4   : > { %1395 = vmatmul.mubr.f32.gmra.mrb[38].mxu1 %v4169_v27 }
  0xa5   : > { %1620 = vmatmul.mubr.f32.gmra.mrb[38].mxu0 %v4205_v60  ;;  %1399 = vmatprep.mubr.f32.mxu1 %v4208_v3  ;;  %v4231_v60 = vld [vmem:[%s3571_s27 + $0xfa] sm:$0xff] }
  0xa6   : > { %1624 = vmatprep.mubr.f32.mxu0 %v4211_v12  ;;  %5062 = vst [vmem:[#allocation21_spill] sm:$0xff] %v4231_v60 }
  0xa8   : > { %1400 = vmatmul.mubr.f32.gmra.mrb[40].mxu1 %v4185_v40 }
  0xa9   : > { %1625 = vmatmul.mubr.f32.gmra.mrb[40].mxu0 %v4218_v43  ;;  %1404 = vmatprep.mubr.f32.mxu1 %v4221_v32  ;;  %v4244_v43 = vld [vmem:[%s3571_s27 + $0x10a] sm:$0xff] }
  0xaa   : > { %1629 = vmatprep.mubr.f32.mxu0 %v4224_v38  ;;  %5064 = vst [vmem:[#allocation23_spill] sm:$0xff] %v4244_v43 }
  0xac   : > { %1405 = vmatmul.mubr.f32.gmra.mrb[42].mxu1 %v4198_v52 }
  0xad   : > { %1630 = vmatmul.mubr.f32.gmra.mrb[42].mxu0 %v4231_v60  ;;  %1409 = vmatprep.mubr.f32.mxu1 %v4234_v11  ;;  %v4257_v60 = vld [vmem:[%s3571_s27 + $0x112] sm:$0xff] }
  0xae   : > { %1634 = vmatprep.mubr.f32.mxu0 %v4237_v14  ;;  %5066 = vst [vmem:[#allocation25_spill] sm:$0xff] %v4257_v60 }
  0xb0   : > { %1410 = vmatmul.mubr.f32.gmra.mrb[44].mxu1 %v4211_v12 }
  0xb1   : > { %1635 = vmatmul.mubr.f32.gmra.mrb[44].mxu0 %v4244_v43  ;;  %1414 = vmatprep.mubr.f32.mxu1 %v4247_v51  ;;  %v4270_v43 = vld [vmem:[%s3571_s27 + $0x122] sm:$0xff] }
  0xb2   : > { %1639 = vmatprep.mubr.f32.mxu0 %v4250_v57  ;;  %5069 = vst [vmem:[#allocation28_spill] sm:$0xff] %v4270_v43 }
  0xb4   : > { %1415 = vmatmul.mubr.f32.gmra.mrb[46].mxu1 %v4224_v38  ;;  %v4289_v38 = vld [vmem:[%s3571_s27 + $0x150] sm:$0xff] }
  0xb5   : > { %1640 = vmatmul.mubr.f32.gmra.mrb[46].mxu0 %v4257_v60  ;;  %1419 = vmatprep.mubr.f32.mxu1 %v4260_v36  ;;  %v4283_v60 = vld [vmem:[%s3571_s27 + $0x12a] sm:$0xff]  ;;  %v4286_v36 = vld [vmem:[%s3571_s27 + $0x139] sm:$0xff]  ;;  %5074 = vst [vmem:[#allocation33_spill] sm:$0xff] %v4289_v38 }
  0xb6   : > { %1644 = vmatprep.mubr.f32.mxu0 %v4263_v23  ;;  %5072 = vst [vmem:[#allocation31_spill] sm:$0xff] %v4283_v60  ;;  %5073 = vst [vmem:[#allocation32_spill] sm:$0xff] %v4286_v36 }
  0xb8   : > { %1420 = vmatmul.mubr.f32.gmra.mrb[48].mxu1 %v4237_v14  ;;  %v4302_v14 = vld [vmem:[%s3571_s27 + $0x158] sm:$0xff] }
  0xb9   : > { %1645 = vmatmul.mubr.f32.gmra.mrb[48].mxu0 %v4270_v43  ;;  %1424 = vmatprep.mubr.f32.mxu1 %v4273_v22  ;;  %v4296_v43 = vld [vmem:[%s3571_s27 + $0x13a] sm:$0xff]  ;;  %5077 = vst [vmem:[#allocation36_spill] sm:$0xff] %v4302_v14 }
  0xba   : > { %1649 = vmatprep.mubr.f32.mxu0 %v4276_v63  ;;  %5075 = vst [vmem:[#allocation34_spill] sm:$0xff] %v4296_v43  ;;  %v4299_v22 = vld [vmem:[%s3571_s27 + $0x141] sm:$0xff] }
  0xbb   : > { %5076 = vst [vmem:[#allocation35_spill] sm:$0xff] %v4299_v22 }
  0xbc   : > { %1425 = vmatmul.mubr.f32.gmra.mrb[50].mxu1 %v4250_v57  ;;  %v4315_v57 = vld [vmem:[%s3571_s27 + $0x168] sm:$0xff] }
  0xbd   : > { %1650 = vmatmul.mubr.f32.gmra.mrb[50].mxu0 %v4283_v60  ;;  %1429 = vmatprep.mubr.f32.mxu1 %v4286_v36  ;;  %v4309_v60 = vld [vmem:[%s3571_s27 + $0x142] sm:$0xff]  ;;  %v4312_v36 = vld [vmem:[%s3571_s27 + $0x151] sm:$0xff] }
  0xbe   : > { %1654 = vmatprep.mubr.f32.mxu0 %v4289_v38  ;;  %5078 = vst [vmem:[#allocation37_spill] sm:$0xff] %v4309_v60  ;;  %5079 = vst [vmem:[#allocation38_spill] sm:$0xff] %v4312_v36 }
  0xc0   : > { %1430 = vmatmul.mubr.f32.gmra.mrb[52].mxu1 %v4263_v23  ;;  %v4328_v23 = vld [vmem:[%s3571_s27 + $0x170] sm:$0xff] }
  0xc1   : > { %1655 = vmatmul.mubr.f32.gmra.mrb[52].mxu0 %v4296_v43  ;;  %1434 = vmatprep.mubr.f32.mxu1 %v4299_v22  ;;  %v4322_v43 = vld [vmem:[%s3571_s27 + $0x152] sm:$0xff] }
  0xc2   : > { %1659 = vmatprep.mubr.f32.mxu0 %v4302_v14  ;;  %5080 = vst [vmem:[#allocation39_spill] sm:$0xff] %v4322_v43  ;;  %v4325_v22 = vld [vmem:[%s3571_s27 + $0x159] sm:$0xff] }
  0xc3   : > { %5081 = vst [vmem:[#allocation40_spill] sm:$0xff] %v4325_v22 }
  0xc4   : > { %1435 = vmatmul.mubr.f32.gmra.mrb[54].mxu1 %v4276_v63  ;;  %v4341_v63 = vld [vmem:[%s3571_s27 + $0x180] sm:$0xff] }
  0xc5   : > { %1660 = vmatmul.mubr.f32.gmra.mrb[54].mxu0 %v4309_v60  ;;  %1439 = vmatprep.mubr.f32.mxu1 %v4312_v36  ;;  %v4335_v60 = vld [vmem:[%s3571_s27 + $0x15a] sm:$0xff]  ;;  %v4338_v36 = vld [vmem:[%s3571_s27 + $0x169] sm:$0xff]  ;;  %5083 = vst [vmem:[#allocation42_spill] sm:$0xff] %v4341_v63 }
  0xc6   : > { %1664 = vmatprep.mubr.f32.mxu0 %v4315_v57  ;;  %5082 = vst [vmem:[#allocation41_spill] sm:$0xff] %v4335_v60 }
  0xc8   : > { %1440 = vmatmul.mubr.f32.gmra.mrb[56].mxu1 %v4289_v38  ;;  %v4354_v38 = vld [vmem:[%s3571_s27 + $0x188] sm:$0xff] }
  0xc9   : > { %1665 = vmatmul.mubr.f32.gmra.mrb[56].mxu0 %v4322_v43  ;;  %1444 = vmatprep.mubr.f32.mxu1 %v4325_v22  ;;  %v4348_v43 = vld [vmem:[%s3571_s27 + $0x16a] sm:$0xff]  ;;  %5085 = vst [vmem:[#allocation44_spill] sm:$0xff] %v4354_v38 }
  0xca   : > { %1669 = vmatprep.mubr.f32.mxu0 %v4328_v23  ;;  %5084 = vst [vmem:[#allocation43_spill] sm:$0xff] %v4348_v43  ;;  %v4351_v22 = vld [vmem:[%s3571_s27 + $0x171] sm:$0xff] }
  0xcc   : > { %1445 = vmatmul.mubr.f32.gmra.mrb[58].mxu1 %v4302_v14  ;;  %v4361_v14 = vld [vmem:[%s3571_s27 + $0x172] sm:$0xff] }
  0xcd   : > { %1670 = vmatmul.mubr.f32.gmra.mrb[58].mxu0 %v4335_v60  ;;  %1449 = vmatprep.mubr.f32.mxu1 %v4338_v36  ;;  %5086 = vst [vmem:[#allocation45_spill] sm:$0xff] %v4361_v14  ;;  %v1214_v60 = vld [vmem:[%s4983_s1 + $0x410] sm:$0xff] }
  0xce   : > { %1674 = vmatprep.mubr.f32.mxu0 %v4341_v63  ;;  %v1217_v63 = vld [vmem:[%s4983_s1 + $0x428] sm:$0xff] }
  0xd0   : > { %1450 = vmatmul.mubr.f32.gmra.mrb[60].mxu1 %v4315_v57 }
  0xd1   : > { %1675 = vmatmul.mubr.f32.gmra.mrb[60].mxu0 %v4348_v43  ;;  %1454 = vmatprep.mubr.f32.mxu1 %v4351_v22  ;;  %v1215_v43 = vld [vmem:[%s4983_s1 + $0x418] sm:$0xff] }
  0xd2   : > { %1679 = vmatprep.mubr.f32.mxu0 %v4354_v38  ;;  %v3038_v38 = vpack.c.bf16 %v1215_v43, %v1214_v60  ;;  %v5121_v60 = vld [vmem:[#allocation31_spill] sm:$0xff] }
  0xd4   : > { %1455 = vmatmul.mubr.f32.gmra.mrb[62].mxu1 %v4328_v23 }
  0xd5   : > { %1680 = vmatmul.mubr.f32.gmra.mrb[62].mxu0 %v4361_v14  ;;  %2014 = vmatprep.mubr.f32.mxu1 %v4021_v31  ;;  %v1216_v14 = vld [vmem:[%s4983_s1 + $0x420] sm:$0xff] }
  0xd6   : > { %1749 = vmatprep.mubr.f32.mxu0 %v3777_v61  ;;  %v5087_v61 = vmov 0.0|0.0  }
  0xd8   : > { %2015 = vmatmul.mubr.f32.vlgmr.msra.gmra.mrb[64].mxu1 %v3966_v42  ;;  %v1218_v42 = vld [vmem:[%s4983_s1 + $0x430] sm:$0xff] }
  0xd9   : > { %1750 = vmatmul.mubr.f32.vlgmr.msra.gmra.mrb[0].mxu0 %v3756_v53  ;;  %3037 = vmatpush3.bf16.msra.mxu1 %v4157_v13  ;;  %v3042_v53 = vpack.c.bf16 %v1217_v63, %v1216_v14  ;;  %v5108_v63 = vld [vmem:[#allocation17_spill] sm:$0xff]  ;;  %v4518_v13 = vld [vmem:[%s3571_s27 + $0x181] sm:$0xff] }
  0xda   : > { %2988 = vmatpush1.bf16.msra.mxu0 %v3733_v41  ;;  %1754 = vmatprep.mubr.f32.mxu0 %v3804_v7  ;;  %v1219_v41 = vld [vmem:[%s4983_s1 + $0x438] sm:$0xff]  ;;  %v1220_v7 = vld [vmem:[%s4983_s1 + $0x440] sm:$0xff]  ;;  %v5116_v14 = vld [vmem:[#allocation23_spill] sm:$0xff] }
  0xdb   : > { %2019 = vmatprep.mubr.f32.mxu1 %v4050_v47  ;;  %2989 = vmatprep.subr.bf16.mxu0 %v5087_v61 }
  0xdc   : > { %2020 = vmatmul.mubr.f32.gmra.mrb[66].mxu1 %v3995_v21  ;;  %3039 = vmatprep.subr.bf16.mxu1 %v3038_v38  ;;  %v5101_v21 = vld [vmem:[#allocation10_spill] sm:$0xff] }
  0xdd   : > { %1755 = vmatmul.mubr.f32.gmra.mrb[2].mxu0 %v3780_v62  ;;  %2024 = vmatprep.mubr.f32.mxu1 %v4080_v0  ;;  %v3046_v62 = vpack.c.bf16 %v1219_v41, %v1218_v42  ;;  %v2676_v42 = vld [vmem:[%s3571_s27 + $0x3a] sm:$0xff] }
  0xde   : > { %1759 = vmatprep.mubr.f32.mxu0 %v3830_v15  ;;  %2991 = vmatpush1.bf16.msra.mxu0 %v3760_v56  ;;  %v1221_v15 = vld [vmem:[%s4983_s1 + $0x448] sm:$0xff]  ;;  %v5122_v41 = vld [vmem:[#allocation34_spill] sm:$0xff] }
  0xdf   : > { %3041 = vmatpush3.bf16.msra.mxu1 %v3038_v38  ;;  %2992 = vmatprep.subr.bf16.mxu0 %v5087_v61  ;;  %v3050_v56 = vpack.c.bf16 %v1221_v15, %v1220_v7 }
  0xe0   : > { %2025 = vmatmul.mubr.f32.gmra.mrb[68].mxu1 %v4024_v35  ;;  %3043 = vmatprep.subr.bf16.mxu1 %v3042_v53  ;;  %v5104_v35 = vld [vmem:[#allocation16_spill] sm:$0xff] }
  0xe1   : > { %1760 = vmatmul.mubr.f32.gmra.mrb[4].mxu0 %v3807_v8  ;;  %2029 = vmatprep.mubr.f32.mxu1 %v4110_v26  ;;  %v1222_v8 = vld [vmem:[%s4983_s1 + $0x450] sm:$0xff] }
  0xe2   : > { %1764 = vmatprep.mubr.f32.mxu0 %v3856_v24  ;;  %2994 = vmatpush1.bf16.msra.mxu0 %v3785_v1  ;;  %v1223_v24 = vld [vmem:[%s4983_s1 + $0x458] sm:$0xff] }
  0xe3   : > { %2995 = vmatprep.subr.bf16.mxu0 %v5087_v61  ;;  %3045 = vmatpush3.bf16.msra.mxu1 %v3042_v53  ;;  %v3054_v1 = vpack.c.bf16 %v1223_v24, %v1222_v8  ;;  %v5123_v8 = vld [vmem:[#allocation37_spill] sm:$0xff]  ;;  %v2679_v24 = vld [vmem:[%s3571_s27 + $0x62] sm:$0xff] }
  0xe4   : > { %2030 = vmatmul.mubr.f32.gmra.mrb[70].mxu1 %v4053_v50  ;;  %3047 = vmatprep.subr.bf16.mxu1 %v3046_v62  ;;  %v5107_v50 = vld [vmem:[#allocation38_spill] sm:$0xff] }
  0xe5   : > { %1765 = vmatmul.mubr.f32.gmra.mrb[6].mxu0 %v3833_v16  ;;  %2034 = vmatprep.mubr.f32.mxu1 %v4146_v58  ;;  %v1224_v16 = vld [vmem:[%s4983_s1 + $0x460] sm:$0xff] }
  0xe6   : > { %1769 = vmatprep.mubr.f32.mxu0 %v3882_v33  ;;  %2997 = vmatpush1.bf16.msra.mxu0 %v3812_v10  ;;  %v1225_v33 = vld [vmem:[%s4983_s1 + $0x468] sm:$0xff] }
  0xe7   : > { %2998 = vmatprep.subr.bf16.mxu0 %v5087_v61  ;;  %3049 = vmatpush3.bf16.msra.mxu1 %v3046_v62  ;;  %v3058_v10 = vpack.c.bf16 %v1225_v33, %v1224_v16  ;;  %v2677_v62 = vld [vmem:[%s3571_s27 + $0x4a] sm:$0xff] }
  0xe8   : > { %2035 = vmatmul.mubr.f32.gmra.mrb[72].mxu1 %v4083_v6  ;;  %3051 = vmatprep.subr.bf16.mxu1 %v3050_v56  ;;  %v5110_v6 = vld [vmem:[#allocation33_spill] sm:$0xff]  ;;  %v2680_v33 = vld [vmem:[%s3571_s27 + $0x6a] sm:$0xff] }
  0xe9   : > { %1770 = vmatmul.mubr.f32.gmra.mrb[8].mxu0 %v3859_v25  ;;  %2039 = vmatprep.mubr.f32.mxu1 %v4166_v20  ;;  %v1226_v25 = vld [vmem:[%s4983_s1 + $0x470] sm:$0xff] }
  0xea   : > { %1774 = vmatprep.mubr.f32.mxu0 %v3908_v44  ;;  %3000 = vmatpush1.bf16.msra.mxu0 %v3838_v19  ;;  %v1227_v44 = vld [vmem:[%s4983_s1 + $0x478] sm:$0xff] }
  0xeb   : > { %3001 = vmatprep.subr.bf16.mxu0 %v5087_v61  ;;  %3053 = vmatpush3.bf16.msra.mxu1 %v3050_v56  ;;  %v3062_v19 = vpack.c.bf16 %v1227_v44, %v1226_v25  ;;  %v2678_v56 = vld [vmem:[%s3571_s27 + $0x52] sm:$0xff]  ;;  %v2681_v25 = vld [vmem:[%s3571_s27 + $0x7a] sm:$0xff] }
  0xec   : > { %2040 = vmatmul.mubr.f32.gmra.mrb[74].mxu1 %v4113_v29  ;;  %3055 = vmatprep.subr.bf16.mxu1 %v3054_v1  ;;  %v5112_v29 = vld [vmem:[#allocation18_spill] sm:$0xff] }
  0xed   : > { %1775 = vmatmul.mubr.f32.gmra.mrb[10].mxu0 %v3885_v34  ;;  %2044 = vmatprep.mubr.f32.mxu1 %v4182_v39  ;;  %v5089_v34 = vld [vmem:[#allocation6_spill] sm:$0xff] }
  0xee   : > { %1779 = vmatprep.mubr.f32.mxu0 %v3934_v54  ;;  %3003 = vmatpush1.bf16.msra.mxu0 %v3864_v28  ;;  %v5088_v28 = vld [vmem:[#allocation9_spill] sm:$0xff]  ;;  %v5093_v54 = vld [vmem:[#allocation7_spill] sm:$0xff] }
  0xef   : > { %3004 = vmatprep.subr.bf16.mxu0 %v5087_v61  ;;  %3057 = vmatpush3.bf16.msra.mxu1 %v3054_v1 }
  0xf0   : > { %2045 = vmatmul.mubr.f32.gmra.mrb[76].mxu1 %v4149_v2  ;;  %3059 = vmatprep.subr.bf16.mxu1 %v3058_v10  ;;  %v5114_v2 = vld [vmem:[#allocation19_spill] sm:$0xff] }
  0xf1   : > { %1780 = vmatmul.mubr.f32.gmra.mrb[12].mxu0 %v3911_v45  ;;  %2049 = vmatprep.mubr.f32.mxu1 %v4195_v49  ;;  %v5091_v45 = vld [vmem:[#allocation26_spill] sm:$0xff] }
  0xf2   : > { %1784 = vmatprep.mubr.f32.mxu0 %v3960_v4  ;;  %3006 = vmatpush1.bf16.msra.mxu0 %v3890_v37  ;;  %v5090_v37 = vld [vmem:[#allocation20_spill] sm:$0xff]  ;;  %v5096_v4 = vld [vmem:[#allocation13_spill] sm:$0xff] }
  0xf3   : > { %3007 = vmatprep.subr.bf16.mxu0 %v5087_v61  ;;  %3061 = vmatpush3.bf16.msra.mxu1 %v3058_v10  ;;  %v5124_v10 = vld [vmem:[#allocation39_spill] sm:$0xff] }
  0xf4   : > { %2050 = vmatmul.mubr.f32.gmra.mrb[78].mxu1 %v4169_v27  ;;  %3063 = vmatprep.subr.bf16.mxu1 %v3062_v19  ;;  %v2673_v27 = vld [vmem:[%s3571_s27 + $0x199] sm:$0xff] }
  0xf5   : > { %1785 = vmatmul.mubr.f32.gmra.mrb[14].mxu0 %v3937_v55  ;;  %2054 = vmatprep.mubr.f32.mxu1 %v4208_v3  ;;  %v5094_v55 = vld [vmem:[#allocation22_spill] sm:$0xff] }
  0xf6   : > { %1789 = vmatprep.mubr.f32.mxu0 %v3989_v17  ;;  %3009 = vmatpush1.bf16.msra.mxu0 %v3916_v48  ;;  %v5092_v48 = vld [vmem:[#allocation11_spill] sm:$0xff]  ;;  %v5099_v17 = vld [vmem:[#allocation32_spill] sm:$0xff] }
  0xf7   : > { %3010 = vmatprep.subr.bf16.mxu0 %v5087_v61  ;;  %3065 = vmatpush3.bf16.msra.mxu1 %v3062_v19 }
  0xf8   : > { %2055 = vmatmul.mubr.f32.gmra.mrb[80].mxu1 %v4185_v40  ;;  %v5120_v40 = vld [vmem:[#allocation28_spill] sm:$0xff] }
  0xf9   : > { %1790 = vmatmul.mubr.f32.gmra.mrb[16].mxu0 %v3963_v5  ;;  %2059 = vmatprep.mubr.f32.mxu1 %v4221_v32  ;;  %v5097_v5 = vld [vmem:[#allocation8_spill] sm:$0xff] }
  0xfa   : > { %1794 = vmatprep.mubr.f32.mxu0 %v4018_v30  ;;  %3012 = vmatpush1.bf16.msra.mxu0 %v3942_v59  ;;  %v5095_v59 = vld [vmem:[#allocation29_spill] sm:$0xff]  ;;  %v5102_v30 = vld [vmem:[#allocation27_spill] sm:$0xff] }
  0xfb   : > { %3013 = vmatprep.subr.bf16.mxu0 %v5087_v61 }
  0xfc   : > { %2060 = vmatmul.mubr.f32.gmra.mrb[82].mxu1 %v4198_v52  ;;  %v2642_v52 = vld [vmem:[%s3571_s27 + $0x1a0] sm:$0xff] }
  0xfd   : > { %1795 = vmatmul.mubr.f32.gmra.mrb[18].mxu0 %v3992_v18  ;;  %2064 = vmatprep.mubr.f32.mxu1 %v4234_v11  ;;  %v5100_v18 = vld [vmem:[#allocation15_spill] sm:$0xff] }
  0xfe   : > { %1799 = vmatprep.mubr.f32.mxu0 %v4047_v46  ;;  %3015 = vmatpush1.bf16.msra.mxu0 %v3970_v9  ;;  %v5098_v9 = vld [vmem:[#allocation24_spill] sm:$0xff] }
  0xff   : > { %3016 = vmatprep.subr.bf16.mxu0 %v5087_v61  ;;  %v5105_v46 = vld [vmem:[#allocation12_spill] sm:$0xff] }
 0x100   : > { %2065 = vmatmul.mubr.f32.gmra.mrb[84].mxu1 %v4211_v12  ;;  %v5115_v12 = vld [vmem:[#allocation21_spill] sm:$0xff] }
 0x101   : > { %1800 = vmatmul.mubr.f32.gmra.mrb[20].mxu0 %v4021_v31  ;;  %2069 = vmatprep.mubr.f32.mxu1 %v4247_v51  ;;  %v5103_v31 = vld [vmem:[#allocation35_spill] sm:$0xff] }
 0x102   : > { %1804 = vmatprep.mubr.f32.mxu0 %v5088_v28  ;;  %3018 = vmatpush1.bf16.msra.mxu0 %v5089_v34  ;;  %v2682_v28 = vld [vmem:[%s3571_s27 + $0x82] sm:$0xff]  ;;  %v5125_v34 = vld [vmem:[#allocation41_spill] sm:$0xff] }
 0x103   : > { %3019 = vmatprep.subr.bf16.mxu0 %v5087_v61 }
 0x104   : > { %2070 = vmatmul.mubr.f32.gmra.mrb[86].mxu1 %v5090_v37  ;;  %v2683_v37 = vld [vmem:[%s3571_s27 + $0x92] sm:$0xff] }
 0x105   : > { %1805 = vmatmul.mubr.f32.gmra.mrb[22].mxu0 %v4050_v47  ;;  %2074 = vmatprep.mubr.f32.mxu1 %v5091_v45  ;;  %v5106_v47 = vld [vmem:[#allocation30_spill] sm:$0xff] }
 0x106   : > { %1809 = vmatprep.mubr.f32.mxu0 %v5092_v48  ;;  %3021 = vmatpush1.bf16.msra.mxu0 %v5093_v54  ;;  %v2684_v54 = vld [vmem:[%s3571_s27 + $0x9a] sm:$0xff] }
 0x107   : > { %3022 = vmatprep.subr.bf16.mxu0 %v5087_v61 }
 0x108   : > { %2075 = vmatmul.mubr.f32.gmra.mrb[88].mxu1 %v5094_v55  ;;  %v5126_v55 = vld [vmem:[#allocation43_spill] sm:$0xff] }
 0x109   : > { %1810 = vmatmul.mubr.f32.gmra.mrb[24].mxu0 %v4080_v0  ;;  %2079 = vmatprep.mubr.f32.mxu1 %v5095_v59  ;;  %v5109_v0 = vld [vmem:[#allocation14_spill] sm:$0xff] }
 0x10a   : > { %1814 = vmatprep.mubr.f32.mxu0 %v5096_v4  ;;  %3024 = vmatpush1.bf16.msra.mxu0 %v5097_v5 }
 0x10b   : > { %3025 = vmatprep.subr.bf16.mxu0 %v5087_v61 }
 0x10c   : > { %2080 = vmatmul.mubr.f32.gmra.mrb[90].mxu1 %v5098_v9  ;;  %v2686_v9 = vld [vmem:[%s3571_s27 + $0xb2] sm:$0xff] }
 0x10d   : > { %1815 = vmatmul.mubr.f32.gmra.mrb[26].mxu0 %v4110_v26  ;;  %2084 = vmatprep.mubr.f32.mxu1 %v5099_v17  ;;  %v5111_v26 = vld [vmem:[#allocation40_spill] sm:$0xff] }
 0x10e   : > { %1819 = vmatprep.mubr.f32.mxu0 %v5100_v18  ;;  %3027 = vmatpush1.bf16.msra.mxu0 %v5101_v21  ;;  %v2687_v18 = vld [vmem:[%s3571_s27 + $0xc2] sm:$0xff] }
 0x10f   : > { %3028 = vmatprep.subr.bf16.mxu0 %v5087_v61 }
 0x110   : > { %2085 = vmatmul.mubr.f32.gmra.mrb[92].mxu1 %v5102_v30  ;;  %v4584_v30 = vld [vmem:[%s3571_s27 + $0x182] sm:$0xff] }
 0x111   : > { %1820 = vmatmul.mubr.f32.gmra.mrb[28].mxu0 %v4146_v58  ;;  %2089 = vmatprep.mubr.f32.mxu1 %v5103_v31  ;;  %v5113_v58 = vld [vmem:[#allocation36_spill] sm:$0xff] }
 0x112   : > { %1824 = vmatprep.mubr.f32.mxu0 %v5104_v35  ;;  %3030 = vmatpush1.bf16.msra.mxu0 %v5105_v46  ;;  %v2688_v35 = vld [vmem:[%s3571_s27 + $0xca] sm:$0xff] }
 0x113   : > { %3031 = vmatprep.subr.bf16.mxu0 %v5087_v61  ;;  %v2675_v61 = vld [vmem:[%s3571_s27 + $0x32] sm:$0xff] }
 0x114   : > { %2090 = vmatmul.mubr.f32.gmra.mrb[94].mxu1 %v5106_v47  ;;  %v4593_v47 = vld [vmem:[%s3571_s27 + $0x18a] sm:$0xff] }
 0x115   : > { %1825 = vmatmul.mubr.f32.gmra.mrb[30].mxu0 %v4166_v20  ;;  %2094 = vmatprep.mubr.f32.mxu1 %v5107_v50  ;;  %v4525_v20 = vld [vmem:[%s3571_s27 + $0x189] sm:$0xff] }
 0x116   : > { %1829 = vmatprep.mubr.f32.mxu0 %v5108_v63  ;;  %3033 = vmatpush1.bf16.msra.mxu0 %v5109_v0  ;;  %v2690_v63 = vld [vmem:[%s3571_s27 + $0xe2] sm:$0xff] }
 0x118   : > { %2095 = vmatmul.mubr.f32.gmra.mrb[96].mxu1 %v5110_v6  ;;  %v2643_v6 = vld [vmem:[%s3571_s27 + $0x31] sm:$0xff] }
 0x119   : > { %1830 = vmatmul.mubr.f32.gmra.mrb[32].mxu0 %v4182_v39  ;;  %2099 = vmatprep.mubr.f32.mxu1 %v5111_v26  ;;  %v2641_v39 = vld [vmem:[%s3571_s27 + $0x198] sm:$0xff] }
 0x11a   : > { %1834 = vmatprep.mubr.f32.mxu0 %v5112_v29  ;;  %v2611_v29 = vld [vmem:[%s3571_s27 + $0x30] sm:$0xff] }
 0x11c   : > { %2100 = vmatmul.mubr.f32.gmra.mrb[98].mxu1 %v5113_v58 }
 0x11d   : > { %1835 = vmatmul.mubr.f32.gmra.mrb[34].mxu0 %v4195_v49  ;;  %2104 = vmatprep.mubr.f32.mxu1 %v4338_v36 }
 0x11e   : > { %1839 = vmatprep.mubr.f32.mxu0 %v5114_v2  ;;  %v2644_v2 = vld [vmem:[%s3571_s27 + $0x39] sm:$0xff] }
 0x120   : > { %2105 = vmatmul.mubr.f32.gmra.mrb[100].mxu1 %v4315_v57  ;;  %v5117_v57 = vld [vmem:[#allocation42_spill] sm:$0xff] }
 0x121   : > { %1840 = vmatmul.mubr.f32.gmra.mrb[36].mxu0 %v4208_v3  ;;  %2109 = vmatprep.mubr.f32.mxu1 %v4351_v22  ;;  %v5118_v3 = vld [vmem:[#allocation25_spill] sm:$0xff] }
 0x122   : > { %1844 = vmatprep.mubr.f32.mxu0 %v5115_v12 }
 0x124   : > { %2110 = vmatmul.mubr.f32.gmra.mrb[102].mxu1 %v4328_v23 }
 0x125   : > { %1845 = vmatmul.mubr.f32.gmra.mrb[38].mxu0 %v4221_v32  ;;  %2114 = vmatprep.mubr.f32.mxu1 %v4518_v13  ;;  %v5119_v32 = vld [vmem:[#allocation44_spill] sm:$0xff] }
 0x126   : > { %1849 = vmatprep.mubr.f32.mxu0 %v5116_v14 }
 0x128   : > { %2115 = vmatmul.mubr.f32.gmra.mrb[104].mxu1 %v5117_v57  ;;  %v2612_v57 = vld [vmem:[%s3571_s27 + $0x38] sm:$0xff] }
 0x129   : > { %1850 = vmatmul.mubr.f32.gmra.mrb[40].mxu0 %v4234_v11  ;;  %2119 = vmatprep.mubr.f32.mxu1 %v4525_v20  ;;  %v2674_v11 = vld [vmem:[%s3571_s27 + $0x1a1] sm:$0xff] }
 0x12a   : > { %1854 = vmatprep.mubr.f32.mxu0 %v5118_v3 }
 0x12b   : > { %v4532_v23 = vpop.f32.mrb[0].mxu1 }
 0x12c   : > { %2120 = vmatmul.mubr.f32.gmra.mrb[106].mxu1 %v5119_v32  ;;  %v1303_v38 = vpop.f32.mrb[1].mxu1 }
 0x12d   : > { %1855 = vmatmul.mubr.f32.gmra.mrb[42].mxu0 %v4247_v51  ;;  %2124 = vmatprep.mubr.f32.mxu1 %v2673_v27  ;;  %v2613_v38 = vld [vmem:[%s3571_s27 + $0x48] sm:$0xff] }
 0x12e   : > { %1859 = vmatprep.mubr.f32.mxu0 %v5120_v40 }
 0x12f   : > { %v4539_v43 = vpop.f32.mrb[2].mxu1 }
 0x130   : > { %2125 = vmatmul.mubr.f32.gmra.mrb[108].mxu1 %v2641_v39  ;;  %v1308_v49 = vpop.f32.mrb[3].mxu1  ;;  %v2646_v39 = vld [vmem:[%s3571_s27 + $0x51] sm:$0xff] }
 0x131   : > { %1860 = vmatmul.mubr.f32.gmra.mrb[44].mxu0 %v5091_v45  ;;  %2129 = vmatprep.mubr.f32.mxu1 %v2674_v11  ;;  %v2614_v11 = vld [vmem:[%s3571_s27 + $0x50] sm:$0xff]  ;;  %v2647_v49 = vld [vmem:[%s3571_s27 + $0x61] sm:$0xff] }
 0x132   : > { %1864 = vmatprep.mubr.f32.mxu0 %v5121_v60 }
 0x133   : > { %v4545_v51 = vpop.f32.mrb[4].mxu1 }
 0x134   : > { %2130 = vmatmul.mubr.f32.gmra.mrb[110].mxu1 %v2642_v52  ;;  %v1313_v53 = vpop.f32.mrb[5].mxu1  ;;  %v2615_v52 = vld [vmem:[%s3571_s27 + $0x60] sm:$0xff] }
 0x135   : > { %1865 = vmatmul.mubr.f32.gmra.mrb[46].mxu0 %v5095_v59  ;;  %2794 = vmatprep.mubr.f32.mxu1 %v2675_v61  ;;  %v2685_v59 = vld [vmem:[%s3571_s27 + $0xaa] sm:$0xff] }
 0x136   : > { %1869 = vmatprep.mubr.f32.mxu0 %v5122_v41  ;;  %v2648_v61 = vld [vmem:[%s3571_s27 + $0x69] sm:$0xff] }
 0x137   : > { %v4551_v7 = vpop.f32.mrb[6].mxu1 }
 0x138   : > { %2795 = vmatmul.mubr.f32.vlgmr.msra.gmra.mrb[112].mxu1 %v2676_v42  ;;  %v1318_v15 = vpop.f32.mrb[7].mxu1  ;;  %v2616_v42 = vld [vmem:[%s3571_s27 + $0x68] sm:$0xff] }
 0x139   : > { %1870 = vmatmul.mubr.f32.gmra.mrb[48].mxu0 %v5099_v17  ;;  %2797 = vmatprep.mubr.f32.mxu1 %v2677_v62  ;;  %v5127_v17 = vld [vmem:[#allocation45_spill] sm:$0xff] }
 0x13a   : > { %1874 = vmatprep.mubr.f32.mxu0 %v5123_v8  ;;  %v2649_v62 = vld [vmem:[%s3571_s27 + $0x79] sm:$0xff] }
 0x13b   : > { %v4557_v1 = vpop.f32.mrb[8].mxu1 }
 0x13c   : > { %2798 = vmatmul.mubr.f32.gmra.mrb[114].mxu1 %v2678_v56  ;;  %v1323_v16 = vpop.f32.mrb[9].mxu1  ;;  %v2617_v56 = vld [vmem:[%s3571_s27 + $0x78] sm:$0xff] }
 0x13d   : > { %1875 = vmatmul.mubr.f32.gmra.mrb[50].mxu0 %v5103_v31  ;;  %2800 = vmatprep.mubr.f32.mxu1 %v2679_v24  ;;  %v2650_v16 = vld [vmem:[%s3571_s27 + $0x81] sm:$0xff] }
 0x13e   : > { %1879 = vmatprep.mubr.f32.mxu0 %v5124_v10 }
 0x13f   : > { %v4563_v44 = vpop.f32.mrb[10].mxu1 }
 0x140   : > { %2801 = vmatmul.mubr.f32.gmra.mrb[116].mxu1 %v2680_v33  ;;  %v1328_v19 = vpop.f32.mrb[11].mxu1 }
 0x141   : > { %1880 = vmatmul.mubr.f32.gmra.mrb[52].mxu0 %v5107_v50  ;;  %2803 = vmatprep.mubr.f32.mxu1 %v2681_v25  ;;  %v2618_v25 = vld [vmem:[%s3571_s27 + $0x80] sm:$0xff] }
 0x142   : > { %1884 = vmatprep.mubr.f32.mxu0 %v5125_v34 }
 0x143   : > { %v4569_v45 = vpop.f32.mrb[12].mxu1 }
 0x144   : > { %2804 = vmatmul.mubr.f32.gmra.mrb[118].mxu1 %v2682_v28  ;;  %v1333_v48 = vpop.f32.mrb[13].mxu1 }
 0x145   : > { %1885 = vmatmul.mubr.f32.gmra.mrb[54].mxu0 %v5111_v26  ;;  %2806 = vmatprep.mubr.f32.mxu1 %v2683_v37 }
 0x146   : > { %1889 = vmatprep.mubr.f32.mxu0 %v5126_v55 }
 0x147   : > { %v4575_v4 = vpop.f32.mrb[14].mxu1 }
 0x148   : > { %2807 = vmatmul.mubr.f32.gmra.mrb[120].mxu1 %v2684_v54  ;;  %v1338_v5 = vpop.f32.mrb[15].mxu1 }
 0x149   : > { %1890 = vmatmul.mubr.f32.gmra.mrb[56].mxu0 %v4338_v36  ;;  %2809 = vmatprep.mubr.f32.mxu1 %v2685_v59  ;;  %v2689_v36 = vld [vmem:[%s3571_s27 + $0xda] sm:$0xff] }
 0x14a   : > { %1894 = vmatprep.mubr.f32.mxu0 %v5127_v17 }
 0x14b   : > { %v4581_v21 = vpop.f32.mrb[16].mxu1 }
 0x14c   : > { %2810 = vmatmul.mubr.f32.gmra.mrb[122].mxu1 %v2686_v9  ;;  %v1343_v31 = vpop.f32.mrb[17].mxu1 }
 0x14d   : > { %1895 = vmatmul.mubr.f32.gmra.mrb[58].mxu0 %v4351_v22  ;;  %2812 = vmatprep.mubr.f32.mxu1 %v2687_v18  ;;  %v2691_v22 = vld [vmem:[%s3571_s27 + $0xf2] sm:$0xff] }
 0x14e   : > { %1899 = vmatprep.mubr.f32.mxu0 %v4584_v30 }
 0x14f   : > { %v4590_v46 = vpop.f32.mrb[18].mxu1 }
 0x150   : > { %2813 = vmatmul.mubr.f32.gmra.mrb[124].mxu1 %v2688_v35  ;;  %v1348_v50 = vpop.f32.mrb[19].mxu1 }
 0x151   : > { %1900 = vmatmul.mubr.f32.gmra.mrb[60].mxu0 %v4518_v13  ;;  %2815 = vmatprep.mubr.f32.mxu1 %v2689_v36 }
 0x152   : > { %1904 = vmatprep.mubr.f32.mxu0 %v4593_v47 }
 0x153   : > { %v4599_v0 = vpop.f32.mrb[20].mxu1 }
 0x154   : > { %2816 = vmatmul.mubr.f32.gmra.mrb[126].mxu1 %v2690_v63  ;;  %v1353_v26 = vpop.f32.mrb[21].mxu1 }
 0x155   : > { %1905 = vmatmul.mubr.f32.gmra.mrb[62].mxu0 %v4525_v20  ;;  %2818 = vmatprep.mubr.f32.mxu1 %v2691_v22  ;;  %v2645_v20 = vld [vmem:[%s3571_s27 + $0x49] sm:$0xff] }
 0x156   : > { %1974 = vmatprep.mubr.f32.mxu0 %v2643_v6 }
 0x157   : > { %v4604_v58 = vpop.f32.mrb[22].mxu1 }
 0x158   : > { %2819 = vmatmul.mubr.f32.gmra.mrb[128].mxu1 %v5115_v12  ;;  %v1358_v13 = vpop.f32.mrb[23].mxu1 }
 0x159   : > { %1975 = vmatmul.mubr.f32.vlgmr.msra.gmra.mrb[0].mxu0 %v2611_v29  ;;  %2821 = vmatprep.mubr.f32.mxu1 %v5116_v14 }
 0x15a   : > { %1979 = vmatprep.mubr.f32.mxu0 %v2644_v2 }
 0x15b   : > { %v4610_v27 = vpop.f32.mrb[24].mxu1 }
 0x15c   : > { %2822 = vmatmul.mubr.f32.gmra.mrb[130].mxu1 %v5118_v3  ;;  %v1363_v32 = vpop.f32.mrb[25].mxu1 }
 0x15d   : > { %1980 = vmatmul.mubr.f32.gmra.mrb[2].mxu0 %v2612_v57  ;;  %2824 = vmatprep.mubr.f32.mxu1 %v5120_v40 }
 0x15e   : > { %1984 = vmatprep.mubr.f32.mxu0 %v2645_v20 }
 0x15f   : > { %v4616_v12 = vpop.f32.mrb[26].mxu1 }
 0x160   : > { %2825 = vmatmul.mubr.f32.gmra.mrb[132].mxu1 %v5121_v60  ;;  %v1368_v14 = vpop.f32.mrb[27].mxu1 }
 0x161   : > { %1985 = vmatmul.mubr.f32.gmra.mrb[4].mxu0 %v2613_v38  ;;  %2827 = vmatprep.mubr.f32.mxu1 %v5122_v41 }
 0x162   : > { %1989 = vmatprep.mubr.f32.mxu0 %v2646_v39 }
 0x163   : > { %v4622_v3 = vpop.f32.mrb[28].mxu1 }
 0x164   : > { %2828 = vmatmul.mubr.f32.gmra.mrb[134].mxu1 %v5123_v8  ;;  %v1373_v40 = vpop.f32.mrb[29].mxu1  ;;  %v2705_v8 = vld [vmem:[%s3571_s27 + $0x19a] sm:$0xff] }
 0x165   : > { %1990 = vmatmul.mubr.f32.gmra.mrb[6].mxu0 %v2614_v11  ;;  %2830 = vmatprep.mubr.f32.mxu1 %v5124_v10  ;;  %v2706_v10 = vld [vmem:[%s3571_s27 + $0x1a2] sm:$0xff] }
 0x166   : > { %1994 = vmatprep.mubr.f32.mxu0 %v2647_v49 }
 0x167   : > { %v4628_v60 = vpop.f32.mrb[30].mxu1 }
 0x168   : > { %2831 = vmatmul.mubr.f32.gmra.mrb[136].mxu1 %v5125_v34  ;;  %v1378_v53 = vpop.f32.mrb[31].mxu1 }
 0x169   : > { %1995 = vmatmul.mubr.f32.gmra.mrb[8].mxu0 %v2615_v52  ;;  %2833 = vmatprep.mubr.f32.mxu1 %v5126_v55 }
 0x16a   : > { %1999 = vmatprep.mubr.f32.mxu0 %v2648_v61 }
 0x16b   : > { %v4634_v41 = vpop.f32.mrb[32].mxu1 }
 0x16c   : > { %2834 = vmatmul.mubr.f32.gmra.mrb[138].mxu1 %v5127_v17  ;;  %v1383_v15 = vpop.f32.mrb[33].mxu1 }
 0x16d   : > { %2000 = vmatmul.mubr.f32.gmra.mrb[10].mxu0 %v2616_v42  ;;  %2836 = vmatprep.mubr.f32.mxu1 %v4584_v30 }
 0x16e   : > { %2004 = vmatprep.mubr.f32.mxu0 %v2649_v62 }
 0x16f   : > { %v4641_v24 = vpop.f32.mrb[34].mxu1 }
 0x170   : > { %2837 = vmatmul.mubr.f32.gmra.mrb[140].mxu1 %v4593_v47  ;;  %v1388_v33 = vpop.f32.mrb[35].mxu1 }
 0x171   : > { %2005 = vmatmul.mubr.f32.gmra.mrb[12].mxu0 %v2617_v56  ;;  %2839 = vmatprep.mubr.f32.mxu1 %v2705_v8 }
 0x172   : > { %2009 = vmatprep.mubr.f32.mxu0 %v2650_v16 }
 0x173   : > { %v4647_v19 = vpop.f32.mrb[36].mxu1 }
 0x174   : > { %2840 = vmatmul.mubr.f32.gmra.mrb[142].mxu1 %v2706_v10  ;;  %v1393_v28 = vpop.f32.mrb[37].mxu1  ;;  %v4678_v10 = vld [vmem:[%s4984_s2] ss:$0 sm:$0xff] }
 0x175   : > { %2010 = vmatmul.mubr.f32.gmra.mrb[14].mxu0 %v2618_v25  ;;  %v1342_v25 = vadd.f32 %v4678_v10, %v4581_v21  ;;  %v1352_v21 = vadd.f32 %v4678_v10, %v4599_v0  ;;  %v1362_v0 = vadd.f32 %v4678_v10, %v4610_v27  ;;  %v1372_v27 = vadd.f32 %v4678_v10, %v4622_v3 }
 0x176   : > { %v1382_v3 = vadd.f32 %v4678_v10, %v4634_v41 }
 0x177   : > { %v4649_v34 = vpop.f32.mrb[38].mxu1 }
 0x178   : > { %v1398_v37 = vpop.f32.mrb[39].mxu1 }
 0x17b   : > { %v4651_v48 = vpop.f32.mrb[40].mxu1 }
 0x17c   : > { %v1403_v54 = vpop.f32.mrb[41].mxu1 }
 0x17f   : > { %v4653_v55 = vpop.f32.mrb[42].mxu1 }
 0x180   : > { %v1408_v59 = vpop.f32.mrb[43].mxu1 }
 0x183   : > { %v4655_v5 = vpop.f32.mrb[44].mxu1 }
 0x184   : > { %v1413_v9 = vpop.f32.mrb[45].mxu1 }
 0x187   : > { %v4657_v17 = vpop.f32.mrb[46].mxu1 }
 0x188   : > { %v1418_v18 = vpop.f32.mrb[47].mxu1 }
 0x189   : > { %v1347_v18 = vadd.f32 %v4678_v10, %v4590_v46  ;;  %v1357_v46 = vadd.f32 %v4678_v10, %v4604_v58  ;;  %v1367_v58 = vadd.f32 %v4678_v10, %v4616_v12  ;;  %v1377_v12 = vadd.f32 %v4678_v10, %v4628_v60 }
 0x18a   : > { %v1387_v60 = vadd.f32 %v4678_v10, %v4641_v24 }
 0x18b   : > { %v4659_v30 = vpop.f32.mrb[48].mxu1 }
 0x18c   : > { %v1423_v31 = vpop.f32.mrb[49].mxu1 }
 0x18f   : > { %v4661_v35 = vpop.f32.mrb[50].mxu1 }
 0x190   : > { %v1428_v36 = vpop.f32.mrb[51].mxu1 }
 0x193   : > { %v4663_v47 = vpop.f32.mrb[52].mxu1 }
 0x194   : > { %v1433_v50 = vpop.f32.mrb[53].mxu1 }
 0x197   : > { %v4665_v63 = vpop.f32.mrb[54].mxu1 }
 0x198   : > { %v1438_v22 = vpop.f32.mrb[55].mxu1 }
 0x19b   : > { %v4667_v6 = vpop.f32.mrb[56].mxu1 }
 0x19c   : > { %v1443_v26 = vpop.f32.mrb[57].mxu1 }
 0x19f   : > { %v4669_v29 = vpop.f32.mrb[58].mxu1 }
 0x1a0   : > { %v1448_v2 = vpop.f32.mrb[59].mxu1 }
 0x1a3   : > { %v4671_v13 = vpop.f32.mrb[60].mxu1 }
 0x1a4   : > { %v1453_v57 = vpop.f32.mrb[61].mxu1 }
 0x1a7   : > { %v4673_v20 = vpop.f32.mrb[62].mxu1 }
 0x1a8   : > { %v1458_v32 = vpop.f32.mrb[63].mxu1 }
 0x1ab   : > { %v2016_v38 = vpop.f32.mrb[64].mxu1 }
 0x1ac   : > { %v2018_v39 = vpop.f32.mrb[65].mxu1 }
 0x1af   : > { %v2021_v14 = vpop.f32.mrb[66].mxu1 }
 0x1b0   : > { %v2023_v11 = vpop.f32.mrb[67].mxu1 }
 0x1b3   : > { %v2026_v49 = vpop.f32.mrb[68].mxu1 }
 0x1b4   : > { %v2028_v40 = vpop.f32.mrb[69].mxu1 }
 0x1b7   : > { %v2031_v52 = vpop.f32.mrb[70].mxu1 }
 0x1b8   : > { %v2033_v61 = vpop.f32.mrb[71].mxu1 }
 0x1bb   : > { %v2036_v53 = vpop.f32.mrb[72].mxu1 }
 0x1bc   : > { %v2038_v42 = vpop.f32.mrb[73].mxu1 }
 0x1bf   : > { %v2041_v62 = vpop.f32.mrb[74].mxu1 }
 0x1c0   : > { %v2043_v15 = vpop.f32.mrb[75].mxu1 }
 0x1c3   : > { %v2046_v56 = vpop.f32.mrb[76].mxu1 }
 0x1c4   : > { %v2048_v8 = vpop.f32.mrb[77].mxu1 }
 0x1c7   : > { %v2051_v16 = vpop.f32.mrb[78].mxu1 }
 0x1c8   : > { %v2053_v33 = vpop.f32.mrb[79].mxu1 }
 0x1cb   : > { %v4682_v28 = vpop.f32.mrb[80].mxu1 }
 0x1cc   : > { %v1791_v37 = vpop.f32.mrb[16].mxu0  ;;  %v2058_v54 = vpop.f32.mrb[81].mxu1 }
 0x1cd   : > { %v3115_v59 = vadd.f32 %v1791_v37, %v1342_v25  ;;  %v1793_v9 = vpop.f32.mrb[17].mxu0 }
 0x1cf   : > { %v4686_v31 = vpop.f32.mrb[82].mxu1  ;;  %v4688_v36 = vadd.f32 %v3115_v59, %v2016_v38 }
 0x1d0   : > { %v1796_v50 = vpop.f32.mrb[18].mxu0  ;;  %v2063_v22 = vpop.f32.mrb[83].mxu1 }
 0x1d1   : > { %v3118_v26 = vadd.f32 %v1796_v50, %v1347_v18  ;;  %v1798_v2 = vpop.f32.mrb[19].mxu0 }
 0x1d3   : > { %v4692_v57 = vpop.f32.mrb[84].mxu1  ;;  %v4694_v32 = vadd.f32 %v3118_v26, %v2021_v14 }
 0x1d4   : > { %v1801_v39 = vpop.f32.mrb[20].mxu0  ;;  %v2068_v11 = vpop.f32.mrb[85].mxu1 }
 0x1d5   : > { %v3121_v40 = vadd.f32 %v1801_v39, %v1352_v21  ;;  %v1803_v61 = vpop.f32.mrb[21].mxu0 }
 0x1d7   : > { %v4698_v38 = vpop.f32.mrb[86].mxu1  ;;  %v4700_v42 = vadd.f32 %v3121_v40, %v2026_v49 }
 0x1d8   : > { %v1806_v15 = vpop.f32.mrb[22].mxu0  ;;  %v2073_v8 = vpop.f32.mrb[87].mxu1 }
 0x1d9   : > { %v3124_v33 = vadd.f32 %v1806_v15, %v1357_v46  ;;  %v1808_v25 = vpop.f32.mrb[23].mxu0 }
 0x1db   : > { %v4704_v14 = vpop.f32.mrb[88].mxu1  ;;  %v4706_v37 = vadd.f32 %v3124_v33, %v2031_v52 }
 0x1dc   : > { %v1811_v54 = vpop.f32.mrb[24].mxu0  ;;  %v2078_v59 = vpop.f32.mrb[89].mxu1 }
 0x1dd   : > { %v3127_v9 = vadd.f32 %v1811_v54, %v1362_v0  ;;  %v1813_v18 = vpop.f32.mrb[25].mxu0 }
 0x1df   : > { %v4710_v49 = vpop.f32.mrb[90].mxu1  ;;  %v4712_v50 = vadd.f32 %v3127_v9, %v2036_v53 }
 0x1e0   : > { %v1816_v22 = vpop.f32.mrb[26].mxu0  ;;  %v2083_v26 = vpop.f32.mrb[91].mxu1 }
 0x1e1   : > { %v3130_v2 = vadd.f32 %v1816_v22, %v1367_v58  ;;  %v1818_v21 = vpop.f32.mrb[27].mxu0 }
 0x1e3   : > { %v4716_v52 = vpop.f32.mrb[92].mxu1  ;;  %v4718_v39 = vadd.f32 %v3130_v2, %v2041_v62 }
 0x1e4   : > { %v1821_v11 = vpop.f32.mrb[28].mxu0  ;;  %v2088_v40 = vpop.f32.mrb[93].mxu1 }
 0x1e5   : > { %v3133_v61 = vadd.f32 %v1821_v11, %v1372_v27  ;;  %v1823_v46 = vpop.f32.mrb[29].mxu0 }
 0x1e7   : > { %v4722_v53 = vpop.f32.mrb[94].mxu1  ;;  %v4724_v15 = vadd.f32 %v3133_v61, %v2046_v56 }
 0x1e8   : > { %v1826_v8 = vpop.f32.mrb[30].mxu0  ;;  %v2093_v33 = vpop.f32.mrb[95].mxu1 }
 0x1e9   : > { %v3136_v25 = vadd.f32 %v1826_v8, %v1377_v12  ;;  %v1828_v0 = vpop.f32.mrb[31].mxu0 }
 0x1eb   : > { %v4728_v62 = vpop.f32.mrb[96].mxu1  ;;  %v4730_v54 = vadd.f32 %v3136_v25, %v2051_v16  ;;  %v1392_v16 = vadd.f32 %v4678_v10, %v4647_v19 }
 0x1ec   : > { %v1831_v59 = vpop.f32.mrb[32].mxu0  ;;  %v2098_v9 = vpop.f32.mrb[97].mxu1 }
 0x1ed   : > { %v3139_v18 = vadd.f32 %v1831_v59, %v1382_v3  ;;  %v1833_v58 = vpop.f32.mrb[33].mxu0 }
 0x1ef   : > { %v4734_v56 = vpop.f32.mrb[98].mxu1  ;;  %v4737_v22 = vadd.f32 %v3139_v18, %v4682_v28  ;;  %v1397_v28 = vadd.f32 %v4678_v10, %v4649_v34 }
 0x1f0   : > { %v1836_v26 = vpop.f32.mrb[34].mxu0  ;;  %v2103_v2 = vpop.f32.mrb[99].mxu1 }
 0x1f1   : > { %v3142_v21 = vadd.f32 %v1836_v26, %v1387_v60  ;;  %v1838_v41 = vpop.f32.mrb[35].mxu0 }
 0x1f3   : > { %v4741_v27 = vpop.f32.mrb[100].mxu1  ;;  %v4744_v11 = vadd.f32 %v3142_v21, %v4686_v31  ;;  %v1402_v31 = vadd.f32 %v4678_v10, %v4651_v48 }
 0x1f4   : > { %v1841_v40 = vpop.f32.mrb[36].mxu0  ;;  %v2108_v61 = vpop.f32.mrb[101].mxu1 }
 0x1f5   : > { %v3145_v24 = vadd.f32 %v1841_v40, %v1392_v16  ;;  %v1843_v46 = vpop.f32.mrb[37].mxu0 }
 0x1f7   : > { %v4748_v12 = vpop.f32.mrb[102].mxu1  ;;  %v4751_v8 = vadd.f32 %v3145_v24, %v4692_v57  ;;  %v1407_v57 = vadd.f32 %v4678_v10, %v4653_v55 }
 0x1f8   : > { %v1846_v33 = vpop.f32.mrb[38].mxu0  ;;  %v2113_v25 = vpop.f32.mrb[103].mxu1 }
 0x1f9   : > { %v3148_v19 = vadd.f32 %v1846_v33, %v1397_v28  ;;  %v1848_v0 = vpop.f32.mrb[39].mxu0 }
 0x1fb   : > { %v4755_v3 = vpop.f32.mrb[104].mxu1  ;;  %v4758_v59 = vadd.f32 %v3148_v19, %v4698_v38  ;;  %v1412_v38 = vadd.f32 %v4678_v10, %v4655_v5 }
 0x1fc   : > { %v1851_v9 = vpop.f32.mrb[40].mxu0  ;;  %v2118_v18 = vpop.f32.mrb[105].mxu1 }
 0x1fd   : > { %v3151_v34 = vadd.f32 %v1851_v9, %v1402_v31  ;;  %v1853_v58 = vpop.f32.mrb[41].mxu0 }
 0x1ff   : > { %v4762_v60 = vpop.f32.mrb[106].mxu1  ;;  %v4765_v26 = vadd.f32 %v3151_v34, %v4704_v14  ;;  %v1417_v14 = vadd.f32 %v4678_v10, %v4657_v17 }
 0x200   : > { %v1856_v2 = vpop.f32.mrb[42].mxu0  ;;  %v2123_v21 = vpop.f32.mrb[107].mxu1 }
 0x201   : > { %v3154_v48 = vadd.f32 %v1856_v2, %v1407_v57  ;;  %v1858_v41 = vpop.f32.mrb[43].mxu0 }
 0x202   : > { %v1432_v41 = vadd.f32 %v4678_v10, %v4663_v47 }
 0x203   : > { %v4769_v16 = vpop.f32.mrb[108].mxu1  ;;  %v4772_v40 = vadd.f32 %v3154_v48, %v4710_v49  ;;  %v1422_v49 = vadd.f32 %v4678_v10, %v4659_v30 }
 0x204   : > { %v1861_v61 = vpop.f32.mrb[44].mxu0  ;;  %v2128_v24 = vpop.f32.mrb[109].mxu1 }
 0x205   : > { %v3157_v55 = vadd.f32 %v1861_v61, %v1412_v38  ;;  %v1863_v46 = vpop.f32.mrb[45].mxu0 }
 0x206   : > { %v1437_v46 = vadd.f32 %v4678_v10, %v4665_v63 }
 0x207   : > { %v4776_v28 = vpop.f32.mrb[110].mxu1  ;;  %v4779_v33 = vadd.f32 %v3157_v55, %v4716_v52  ;;  %v1427_v52 = vadd.f32 %v4678_v10, %v4661_v35 }
 0x208   : > { %v1866_v25 = vpop.f32.mrb[46].mxu0  ;;  %v2133_v19 = vpop.f32.mrb[111].mxu1 }
 0x209   : > { %v3160_v5 = vadd.f32 %v1866_v25, %v1417_v14  ;;  %v1868_v0 = vpop.f32.mrb[47].mxu0 }
 0x20a   : > { %v1442_v0 = vadd.f32 %v4678_v10, %v4667_v6  ;;  %v1447_v6 = vadd.f32 %v4678_v10, %v4669_v29 }
 0x20b   : > { %v4783_v31 = vpop.f32.mrb[112].mxu1  ;;  %v4786_v9 = vadd.f32 %v3160_v5, %v4722_v53 }
 0x20c   : > { %v1871_v18 = vpop.f32.mrb[48].mxu0  ;;  %v4788_v34 = vpop.f32.mrb[113].mxu1 }
 0x20d   : > { %v3163_v17 = vadd.f32 %v1871_v18, %v1422_v49  ;;  %v1873_v58 = vpop.f32.mrb[49].mxu0 }
 0x20f   : > { %v4792_v57 = vpop.f32.mrb[114].mxu1  ;;  %v4795_v2 = vadd.f32 %v3163_v17, %v4728_v62 }
 0x210   : > { %v1876_v30 = vpop.f32.mrb[50].mxu0  ;;  %v4797_v21 = vpop.f32.mrb[115].mxu1 }
 0x211   : > { %v3166_v53 = vadd.f32 %v1876_v30, %v1427_v52  ;;  %v1878_v48 = vpop.f32.mrb[51].mxu0 }
 0x213   : > { %v4801_v38 = vpop.f32.mrb[116].mxu1  ;;  %v4804_v61 = vadd.f32 %v3166_v53, %v4734_v56 }
 0x214   : > { %v1881_v35 = vpop.f32.mrb[52].mxu0  ;;  %v4806_v24 = vpop.f32.mrb[117].mxu1 }
 0x215   : > { %v3169_v55 = vadd.f32 %v1881_v35, %v1432_v41  ;;  %v1883_v62 = vpop.f32.mrb[53].mxu0 }
 0x216   : > { %v1452_v62 = vadd.f32 %v4678_v10, %v4671_v13 }
 0x217   : > { %v4811_v14 = vpop.f32.mrb[118].mxu1  ;;  %v4814_v25 = vadd.f32 %v3169_v55, %v4741_v27 }
 0x218   : > { %v1886_v47 = vpop.f32.mrb[54].mxu0  ;;  %v4816_v19 = vpop.f32.mrb[119].mxu1 }
 0x219   : > { %v3172_v56 = vadd.f32 %v1886_v47, %v1437_v46  ;;  %v1888_v5 = vpop.f32.mrb[55].mxu0 }
 0x21b   : > { %v2808_v49 = vpop.f32.mrb[120].mxu1  ;;  %v4823_v18 = vadd.f32 %v3172_v56, %v4748_v12 }
 0x21c   : > { %v1891_v63 = vpop.f32.mrb[56].mxu0  ;;  %v2247_v17 = vadd.f32 %v4694_v32, %v2808_v49  ;;  %v2241_v58 = vpop.f32.mrb[121].mxu1 }
 0x21d   : > { %v3175_v27 = vadd.f32 %v1891_v63, %v1442_v0  ;;  %v1893_v52 = vpop.f32.mrb[57].mxu0  ;;  %v2242_v30 = vadd.f32 %v4688_v36, %v2241_v58 }
 0x21e   : > { %2369 = vst [vmem:[%s4827_s4 + $0x48] sm:$0xff] %v2247_v17 }
 0x21f   : > { %2368 = vst [vmem:[%s4827_s4 + $0x40] sm:$0xff] %v2242_v30  ;;  %v2811_v12 = vpop.f32.mrb[122].mxu1  ;;  %v4834_v53 = vadd.f32 %v3175_v27, %v4755_v3 }
 0x220   : > { %v1896_v32 = vpop.f32.mrb[58].mxu0  ;;  %v2257_v48 = vadd.f32 %v4706_v37, %v2811_v12  ;;  %v2251_v36 = vpop.f32.mrb[123].mxu1 }
 0x221   : > { %v3178_v41 = vadd.f32 %v1896_v32, %v1447_v6  ;;  %v1898_v35 = vpop.f32.mrb[59].mxu0  ;;  %v2252_v55 = vadd.f32 %v4700_v42, %v2251_v36  ;;  %v1457_v42 = vadd.f32 %v4678_v10, %v4673_v20 }
 0x222   : > { %2371 = vst [vmem:[%s4827_s4 + $0x58] sm:$0xff] %v2257_v48 }
 0x223   : > { %2370 = vst [vmem:[%s4827_s4 + $0x50] sm:$0xff] %v2252_v55  ;;  %v2814_v29 = vpop.f32.mrb[124].mxu1  ;;  %v4843_v46 = vadd.f32 %v3178_v41, %v4762_v60 }
 0x224   : > { %v1901_v3 = vpop.f32.mrb[60].mxu0  ;;  %v2267_v47 = vadd.f32 %v4718_v39, %v2814_v29  ;;  %v2261_v37 = vpop.f32.mrb[125].mxu1 }
 0x225   : > { %v3181_v56 = vadd.f32 %v1901_v3, %v1452_v62  ;;  %v1903_v5 = vpop.f32.mrb[61].mxu0  ;;  %v2262_v0 = vadd.f32 %v4712_v50, %v2261_v37  ;;  %v1302_v50 = vadd.f32 %v4678_v10, %v4532_v23  ;;  %v1307_v23 = vadd.f32 %v4678_v10, %v4539_v43 }
 0x226   : > { %2373 = vst [vmem:[%s4827_s4 + $0x68] sm:$0xff] %v2267_v47  ;;  %v1312_v43 = vadd.f32 %v4678_v10, %v4545_v51  ;;  %v1317_v51 = vadd.f32 %v4678_v10, %v4551_v7  ;;  %v1322_v7 = vadd.f32 %v4678_v10, %v4557_v1  ;;  %v1327_v1 = vadd.f32 %v4678_v10, %v4563_v44 }
 0x227   : > { %2372 = vst [vmem:[%s4827_s4 + $0x60] sm:$0xff] %v2262_v0  ;;  %v2817_v13 = vpop.f32.mrb[126].mxu1  ;;  %v4852_v49 = vadd.f32 %v3181_v56, %v4769_v16  ;;  %v1332_v44 = vadd.f32 %v4678_v10, %v4569_v45  ;;  %v1337_v45 = vadd.f32 %v4678_v10, %v4575_v4 }
 0x228   : > { %v1906_v60 = vpop.f32.mrb[62].mxu0  ;;  %v2277_v63 = vadd.f32 %v4730_v54, %v2817_v13  ;;  %v2271_v39 = vpop.f32.mrb[127].mxu1 }
 0x229   : > { %v3184_v17 = vadd.f32 %v1906_v60, %v1457_v42  ;;  %v1908_v58 = vpop.f32.mrb[63].mxu0  ;;  %v2272_v27 = vadd.f32 %v4724_v15, %v2271_v39 }
 0x22a   : > { %2375 = vst [vmem:[%s4827_s4 + $0x78] sm:$0xff] %v2277_v63 }
 0x22b   : > { %2374 = vst [vmem:[%s4827_s4 + $0x70] sm:$0xff] %v2272_v27  ;;  %v2820_v20 = vpop.f32.mrb[128].mxu1  ;;  %v4861_v16 = vadd.f32 %v3184_v17, %v4776_v28 }
 0x22c   : > { %v1976_v52 = vpop.f32.mrb[0].mxu0  ;;  %v2287_v54 = vadd.f32 %v4744_v11, %v2820_v20  ;;  %v2281_v30 = vpop.f32.mrb[129].mxu1 }
 0x22d   : > { %v3099_v6 = vadd.f32 %v1976_v52, %v1302_v50  ;;  %v1978_v12 = vpop.f32.mrb[1].mxu0  ;;  %v2282_v32 = vadd.f32 %v4737_v22, %v2281_v30 }
 0x22e   : > { %2377 = vst [vmem:[%s4827_s4 + $0x88] sm:$0xff] %v2287_v54 }
 0x22f   : > { %v2202_v15 = vadd.f32 %v3099_v6, %v4788_v34  ;;  %2376 = vst [vmem:[%s4827_s4 + $0x80] sm:$0xff] %v2282_v32  ;;  %v2823_v48 = vpop.f32.mrb[130].mxu1 }
 0x230   : > { %v1981_v28 = vpop.f32.mrb[2].mxu0  ;;  %v2297_v36 = vadd.f32 %v4758_v59, %v2823_v48  ;;  %v2291_v11 = vpop.f32.mrb[131].mxu1 }
 0x231   : > { %2360 = vst [vmem:[%s4827_s4] sm:$0xff] %v2202_v15  ;;  %v3101_v41 = vadd.f32 %v1981_v28, %v1307_v23  ;;  %v1983_v35 = vpop.f32.mrb[3].mxu0  ;;  %v2292_v22 = vadd.f32 %v4751_v8, %v2291_v11 }
 0x232   : > { %2379 = vst [vmem:[%s4827_s4 + $0x98] sm:$0xff] %v2297_v36 }
 0x233   : > { %v2207_v34 = vadd.f32 %v3101_v41, %v4783_v31  ;;  %2378 = vst [vmem:[%s4827_s4 + $0x90] sm:$0xff] %v2292_v22  ;;  %v2826_v55 = vpop.f32.mrb[132].mxu1 }
 0x234   : > { %v1986_v62 = vpop.f32.mrb[4].mxu0  ;;  %v2307_v59 = vadd.f32 %v4772_v40, %v2826_v55  ;;  %v2301_v29 = vpop.f32.mrb[133].mxu1 }
 0x235   : > { %2361 = vst [vmem:[%s4827_s4 + $0x8] sm:$0xff] %v2207_v34  ;;  %v3103_v3 = vadd.f32 %v1986_v62, %v1312_v43  ;;  %v1988_v47 = vpop.f32.mrb[5].mxu0  ;;  %v2302_v8 = vadd.f32 %v4765_v26, %v2301_v29 }
 0x236   : > { %2381 = vst [vmem:[%s4827_s4 + $0xa8] sm:$0xff] %v2307_v59 }
 0x237   : > { %v2212_v31 = vadd.f32 %v3103_v3, %v4797_v21  ;;  %2380 = vst [vmem:[%s4827_s4 + $0xa0] sm:$0xff] %v2302_v8  ;;  %v2829_v37 = vpop.f32.mrb[134].mxu1 }
 0x238   : > { %v1991_v56 = vpop.f32.mrb[6].mxu0  ;;  %v2317_v40 = vadd.f32 %v4786_v9, %v2829_v37  ;;  %v2311_v5 = vpop.f32.mrb[135].mxu1 }
 0x239   : > { %2362 = vst [vmem:[%s4827_s4 + $0x10] sm:$0xff] %v2212_v31  ;;  %v3105_v0 = vadd.f32 %v1991_v56, %v1317_v51  ;;  %v1993_v42 = vpop.f32.mrb[7].mxu0  ;;  %v2312_v26 = vadd.f32 %v4779_v33, %v2311_v5 }
 0x23a   : > { %2383 = vst [vmem:[%s4827_s4 + $0xb8] sm:$0xff] %v2317_v40 }
 0x23b   : > { %v2217_v21 = vadd.f32 %v3105_v0, %v4792_v57  ;;  %2382 = vst [vmem:[%s4827_s4 + $0xb0] sm:$0xff] %v2312_v26  ;;  %v2832_v13 = vpop.f32.mrb[136].mxu1 }
 0x23c   : > { %v1996_v60 = vpop.f32.mrb[8].mxu0  ;;  %v2327_v9 = vadd.f32 %v4804_v61, %v2832_v13  ;;  %v2321_v63 = vpop.f32.mrb[137].mxu1 }
 0x23d   : > { %2363 = vst [vmem:[%s4827_s4 + $0x18] sm:$0xff] %v2217_v21  ;;  %v3107_v39 = vadd.f32 %v1996_v60, %v1322_v7  ;;  %v1998_v17 = vpop.f32.mrb[9].mxu0  ;;  %v2322_v33 = vadd.f32 %v4795_v2, %v2321_v63 }
 0x23e   : > { %2385 = vst [vmem:[%s4827_s4 + $0xc8] sm:$0xff] %v2327_v9 }
 0x23f   : > { %v2222_v57 = vadd.f32 %v3107_v39, %v4806_v24  ;;  %2384 = vst [vmem:[%s4827_s4 + $0xc0] sm:$0xff] %v2322_v33  ;;  %v2835_v58 = vpop.f32.mrb[138].mxu1 }
 0x240   : > { %v2001_v27 = vpop.f32.mrb[10].mxu0  ;;  %v2337_v61 = vadd.f32 %v4823_v18, %v2835_v58  ;;  %v2331_v50 = vpop.f32.mrb[139].mxu1 }
 0x241   : > { %2364 = vst [vmem:[%s4827_s4 + $0x20] sm:$0xff] %v2222_v57  ;;  %v3109_v20 = vadd.f32 %v2001_v27, %v1327_v1  ;;  %v2003_v52 = vpop.f32.mrb[11].mxu0  ;;  %v2332_v2 = vadd.f32 %v4814_v25, %v2331_v50 }
 0x242   : > { %2387 = vst [vmem:[%s4827_s4 + $0xd8] sm:$0xff] %v2337_v61 }
 0x243   : > { %v2227_v24 = vadd.f32 %v3109_v20, %v4801_v38  ;;  %2386 = vst [vmem:[%s4827_s4 + $0xd0] sm:$0xff] %v2332_v2  ;;  %v2838_v54 = vpop.f32.mrb[140].mxu1 }
 0x244   : > { %v2006_v30 = vpop.f32.mrb[12].mxu0  ;;  %v2347_v18 = vadd.f32 %v4843_v46, %v2838_v54  ;;  %v2341_v6 = vpop.f32.mrb[141].mxu1 }
 0x245   : > { %2365 = vst [vmem:[%s4827_s4 + $0x28] sm:$0xff] %v2227_v24  ;;  %v3111_v12 = vadd.f32 %v2006_v30, %v1332_v44  ;;  %v2008_v32 = vpop.f32.mrb[13].mxu0  ;;  %v2342_v25 = vadd.f32 %v4834_v53, %v2341_v6 }
 0x246   : > { %2389 = vst [vmem:[%s4827_s4 + $0xe8] sm:$0xff] %v2347_v18 }
 0x247   : > { %v2232_v38 = vadd.f32 %v3111_v12, %v4816_v19  ;;  %2388 = vst [vmem:[%s4827_s4 + $0xe0] sm:$0xff] %v2342_v25  ;;  %v2841_v23 = vpop.f32.mrb[142].mxu1 }
 0x248   : > { %v2011_v46 = vpop.f32.mrb[14].mxu0  ;;  %v2357_v15 = vadd.f32 %v4861_v16, %v2841_v23  ;;  %v2351_v48 = vpop.f32.mrb[143].mxu1 }
 0x249   : > { %2366 = vst [vmem:[%s4827_s4 + $0x30] sm:$0xff] %v2232_v38  ;;  %v3113_v53 = vadd.f32 %v2011_v46, %v1337_v45  ;;  %v2013_v28 = vpop.f32.mrb[15].mxu0  ;;  %v2352_v36 = vadd.f32 %v4852_v49, %v2351_v48 }
 0x24a   : > { %2391 = vst [vmem:[%s4827_s4 + $0xf8] sm:$0xff] %v2357_v15 }
 0x24b   : > { %v2237_v4 = vadd.f32 %v3113_v53, %v4811_v14  ;;  %2390 = vst [vmem:[%s4827_s4 + $0xf0] sm:$0xff] %v2352_v36 }
 0x24d   : > { %2367 = vst [vmem:[%s4827_s4 + $0x38] sm:$0xff] %v2237_v4 }
 0x24e   : > { %3338 = shalt.err (!%p3335_p5)
}
 0x24f   : > { %s3339_s21 = scalar_lea.hbm %s4927_s9, 4096  ;;  %s3343_s27 = scalar_lea.hbm %s4985_s3, 8192 }
 0x250   : > { %p3340_p6 = scmp.ne.s32.totalorder %s4927_s9, %s3339_s21  ;;  %p3344_p10 = scmp.lt.u32.totalorder %s4927_s9, %s4985_s3 }
 0x251   : > { %p3345_p11 = scmp.lt.u32.totalorder %s3343_s27, %s3339_s21  ;;  %p3347_p13 = scmp.lt.u32.totalorder %s3339_s21, %s4927_s9 }
 0x252   : > { %p3341_p7 = pnand %p3340_p6, %p3469_p4 }
 0x253   : > { %p3346_p12 = por %p3345_p11, %p3344_p10 }
 0x254   : > { %p3342_p9 = pneg %p3341_p7 }
 0x255   : > { %p3348_p0 = por %p3347_p13, %p3346_p12 }
 0x257   : > { %p3349_p1 = pnand %p3348_p0, %p3342_p9 }
 0x259   : > { %3352 = shalt.err (!%p3349_p1)
}
 0x25a   : > { %s3407_s30 = smov 128   ;;  %s3408_s4 = smov 8  }
 0x25b   : > { %3267 = dma.vmem_to_hbm [thread:$0]  (%p3469_p4), %s4929_s7, 4096, %s4927_s9, %s4936_s15, %s3407_s30, %s3407_s30, %s3408_s4  }
 0x25c PF: > { %p3273_p2 = scmp.ge.s32.totalorder %s3403_s17, 2  ;;  %s2422_s5 = sand.u32 1, %s3383_s12  }
 0x25d   : > { %s2423_s6 = scalar_lea.sflag [#allocation4], %s2422_s5 }
 0x25e   : > { %p3270_p3 = pnand %p3273_p2, %p3476_p8 }
 0x260   : > { %3378 = dma.done.wait (!%p3270_p3), %s2423_s6, 4096  }
 0x261   : > { %3380 = vsyncadd (!%p3270_p3), %s2423_s6, 4294963200  ;;  %s16_s17 = sadd.s32 1, %s3403_s17   ;;  %s5128_s12 = smov %s3387_s13 }
 0x262   : > { %p13_p5 = scmp.ge.s32.totalorder %s16_s17, 4   ;;  %s5129_s13 = smov %s3391_s14 }
 0x263   : > { %s5130_s14 = smov %s3482_s25  ;;  %s5131_s15 = smov %s3399_s16 }
 0x264   : > { %s5132_s16 = smov %s5134_s20  ;;  %15 = sbr.rel (!%p13_p5) target bundleno = 4 (0x4), region = 79 }
 0x26b   :  { %2428 = vsyncpa [#allocation4], 1 }
 0x26c   :  { %2430 = vsyncpa [#allocation4 + $0x1], 1 }

</bundles_post_ra>
